<compile_context>
chip_gen: v7x
topology: tpu7x:2x2x1
jax: 0.10.0
libtpu: 0.0.40
codegen_flags: <defaults>
</compile_context>

<pallas_src>
import functools

import jax
import jax.numpy as jnp
from jax import lax
from jax.experimental import pallas as pl
from jax.experimental.pallas import tpu as pltpu


def _round_up(x, m):
    return ((x + m - 1) // m) * m


def _vmem_capacity_bytes():
    try:
        info = pltpu.get_tpu_info()
        for name in ("vmem_capacity_bytes", "vmem_bytes", "vmem_size_bytes"):
            v = getattr(info, name, None)
            if v:
                return int(v)
    except Exception:
        pass
    return 64 * 1024 * 1024  # conservative default (v7x-sized)


_VMEM_CAP = _vmem_capacity_bytes()
# v5e/v6e (128 MiB physical): ~64 MiB scoped, tm up to 1024.
# v7x (64 MiB physical): 32 MiB scoped, tm up to 512.
_VMEM_LIMIT = min(_VMEM_CAP // 2, 96 * 1024 * 1024)
_MAX_TM = 1024 if _VMEM_CAP >= 100 * 1024 * 1024 else 512


# ----------------- fused (normalize+)patch-embed teacher|student -------------

def _extract_kernel(a_ref, w_ref, b_ref, o_ref, *, cp):
    # a: (tm, K) bf16 patches; w: (K, N) bf16 (ImageNet Normalize folded in);
    # b: (1, N) f32; o: (tm, N) bf16.  Columns [0, cp) = teacher (relu),
    # columns [cp, 2*cp) = student (gelu).  cp is a multiple of 128 so both
    # halves are lane-aligned static slices.
    y = jnp.dot(a_ref[...], w_ref[...], preferred_element_type=jnp.float32)
    y = y + b_ref[...]
    t = jnp.maximum(y[:, :cp], 0.0)
    # TODO(synk): PyTorch nn.GELU default is exact erf; tanh approximation used.
    s = jax.nn.gelu(y[:, cp:], approximate=True)
    o_ref[:, :cp] = t.astype(o_ref.dtype)
    o_ref[:, cp:] = s.astype(o_ref.dtype)


def extract_features(patches_bf16, w_cat, b_cat, cp):
    """(M, K) bf16 patches -> (M, 2*cp) bf16 teacher|student features."""
    M, K = patches_bf16.shape
    N = w_cat.shape[1]
    tm = M if M <= _MAX_TM else _MAX_TM
    grid = (pl.cdiv(M, tm),)
    kernel = functools.partial(_extract_kernel, cp=cp)
    return pl.pallas_call(
        kernel,
        out_shape=jax.ShapeDtypeStruct((M, N), jnp.bfloat16),
        grid=grid,
        in_specs=[
            pl.BlockSpec((tm, K), lambda i: (i, 0)),
            pl.BlockSpec((K, N), lambda i: (0, 0)),   # weight resident (DMA once)
            pl.BlockSpec((1, N), lambda i: (0, 0)),
        ],
        out_specs=pl.BlockSpec((tm, N), lambda i: (i, 0)),
        compiler_params=pltpu.CompilerParams(
            dimension_semantics=("parallel",),
            vmem_limit_bytes=_VMEM_LIMIT),
    )(patches_bf16, w_cat, b_cat)


# ----- in-kernel separable 3x3 avg-pool (zero halo built in a VMEM scratch) ---

def _separable_pool(x, pad_ref):
    # x: (1, Hl, Wl, C) f32.  pad_ref: (1, Hl+2, Wl+2, C) f32 scratch.
    # AvgPool2d(3, 1, 1) with count_include_pad=True (divisor 9).
    _, Hl, Wl, _ = x.shape
    pad_ref[...] = jnp.zeros_like(pad_ref)
    pad_ref[:, 1:Hl + 1, 1:Wl + 1, :] = x
    rows = (pad_ref[:, 0:Hl, :, :]
            + pad_ref[:, 1:Hl + 1, :, :]
            + pad_ref[:, 2:Hl + 2, :, :])            # (1, Hl, Wl+2, C)
    pad_ref[:, 0:Hl, :, :] = rows
    pooled = (pad_ref[:, 0:Hl, 0:Wl, :]
              + pad_ref[:, 0:Hl, 1:Wl + 1, :]
              + pad_ref[:, 0:Hl, 2:Wl + 2, :]) * (1.0 / 9.0)
    return pooled


# --------- fused pool + cosine distance + bilinear resize + accumulate --------

def _fused_map_kernel(f_ref, rh_ref, rwt_ref, amap_ref, o_ref, pad_ref,
                      *, cp, scale, use_pool):
    # f: (1, Hl, Wl, 2*cp) bf16; rh: (Ho, Hl) f32; rwt: (Wl, Wo) f32;
    # amap/o: (1, Ho, Wo) f32 (aliased).  Computes
    #   o = amap + scale * resize(1 - cos(pool(teacher), pool(student))).
    x = f_ref[...].astype(jnp.float32)
    pooled = _separable_pool(x, pad_ref) if use_pool else x

    t = pooled[..., :cp]
    s = pooled[..., cp:]
    eps2 = 1e-16  # (1e-8)**2 — rsqrt(max(n2, eps2)) == 1/max(norm, 1e-8)
    dot = jnp.sum(t * s, axis=-1)                    # (1, Hl, Wl)
    nt = jnp.sum(t * t, axis=-1)
    ns = jnp.sum(s * s, axis=-1)
    cos = dot * lax.rsqrt(jnp.maximum(nt, eps2)) * lax.rsqrt(jnp.maximum(ns, eps2))
    d = (1.0 - cos)[0]                               # (Hl, Wl)

    # Bilinear upsample:  up = Rh @ d @ Rw^T
    tmp = jnp.dot(rh_ref[...], d, preferred_element_type=jnp.float32)      # (Ho, Wl)
    up = jnp.dot(tmp, rwt_ref[...], preferred_element_type=jnp.float32)    # (Ho, Wo)

    o_ref[...] = amap_ref[...] + (scale * up)[None, :, :]


def fused_anomaly_accumulate(feats4, rh, rwt, amap, cp, use_pool, scale):
    """feats4: (B, Hl, Wl, 2*cp) bf16, amap: (B, Ho, Wo) f32 -> updated amap."""
    # TODO(synk): for very large feature maps on v7x (64 MiB VMEM), tile this
    # kernel over H rows with a halo instead of one full-map block per batch.
    B, Hl, Wl, C = feats4.shape
    _, Ho, Wo = amap.shape
    kernel = functools.partial(_fused_map_kernel, cp=cp, scale=scale,
                               use_pool=use_pool)
    return pl.pallas_call(
        kernel,
        out_shape=jax.ShapeDtypeStruct((B, Ho, Wo), jnp.float32),
        grid=(B,),
        in_specs=[
            pl.BlockSpec((1, Hl, Wl, C), lambda b: (b, 0, 0, 0)),
            pl.BlockSpec((Ho, Hl), lambda b: (0, 0)),
            pl.BlockSpec((Wl, Wo), lambda b: (0, 0)),
            pl.BlockSpec((1, Ho, Wo), lambda b: (b, 0, 0)),
        ],
        out_specs=pl.BlockSpec((1, Ho, Wo), lambda b: (b, 0, 0)),
        scratch_shapes=[pltpu.VMEM((1, Hl + 2, Wl + 2, C), jnp.float32)],
        input_output_aliases={3: 0},   # accumulate in place into amap
        compiler_params=pltpu.CompilerParams(
            dimension_semantics=("parallel",),
            vmem_limit_bytes=_VMEM_LIMIT),
    )(feats4, rh, rwt, amap)


# ----------------------- plain 3x3 avg-pool (training path) ------------------

def _pool_kernel(f_ref, o_ref, pad_ref):
    x = f_ref[...].astype(jnp.float32)
    o_ref[...] = _separable_pool(x, pad_ref)


def avg_pool_3x3(feats4_bf16):
    B, Hl, Wl, N = feats4_bf16.shape
    return pl.pallas_call(
        _pool_kernel,
        out_shape=jax.ShapeDtypeStruct((B, Hl, Wl, N), jnp.float32),
        grid=(B,),
        in_specs=[pl.BlockSpec((1, Hl, Wl, N), lambda b: (b, 0, 0, 0))],
        out_specs=pl.BlockSpec((1, Hl, Wl, N), lambda b: (b, 0, 0, 0)),
        scratch_shapes=[pltpu.VMEM((1, Hl + 2, Wl + 2, N), jnp.float32)],
        compiler_params=pltpu.CompilerParams(
            dimension_semantics=("parallel",),
            vmem_limit_bytes=_VMEM_LIMIT),
    )(feats4_bf16)


# ------------------------------ glue (XLA relayout) ---------------------------

def _bilinear_matrix(out_size, in_size):
    # F.interpolate(mode="bilinear", align_corners=False) weights.
    d = jnp.arange(out_size, dtype=jnp.float32)
    scale = in_size / out_size
    src = jnp.clip((d + 0.5) * scale - 0.5, 0.0, in_size - 1)
    i0 = jnp.floor(src).astype(jnp.int32)
    i1 = jnp.minimum(i0 + 1, in_size - 1)
    w1 = src - i0.astype(jnp.float32)
    w0 = 1.0 - w1
    rows = jnp.arange(out_size)
    R = jnp.zeros((out_size, in_size), jnp.float32)
    R = R.at[rows, i0].add(w0)
    R = R.at[rows, i1].add(w1)
    return R


def _patchify(x, p):
    # (B, C, H, W) -> (B*(H//p)*(W//p), C*p*p); K is c-major then (dy, dx).
    B, C, H, W = x.shape
    Hl, Wl = H // p, W // p
    xp = x.reshape(B, C, Hl, p, Wl, p).transpose(0, 2, 4, 1, 3, 5)
    return xp.reshape(B * Hl * Wl, C * p * p), (Hl, Wl)


# ----------------------------------- model ------------------------------------

class MMRPallas:
    """JAX/Pallas re-implementation of MMR.forward."""

    def __init__(self, layers, input_size, backbone, patch_size, in_chans,
                 embed_dim, depth, num_heads, mlp_ratio, scale_factors,
                 fpn_output_dim, use_feature_pooler=True, use_tiler=False,
                 seed=1):
        # TODO(synk): Tiler path (use_tiler=True) not implemented (default False).
        assert not use_tiler, "Tiler path not implemented"
        assert in_chans == 3, "ImageNet Normalize is 3-channel"
        self.layers = list(layers)
        self.input_size = tuple(input_size)
        self.use_feature_pooler = use_feature_pooler
        self.mean = jnp.array([0.485, 0.456, 0.406], jnp.float32)
        self.std = jnp.array([0.229, 0.224, 0.225], jnp.float32)
        base_strides = {"layer1": 4, "layer2": 8, "layer3": 16, "layer4": 32}
        self.strides = {l: base_strides[l] for l in self.layers}
        self.channels = {l: int(c) for l, c in zip(self.layers, fpn_output_dim)}
        # pad each half to a multiple of 128 lanes (zero cols: exact no-op for
        # relu/gelu/pool/cosine) -> lane-dense, MXU-aligned matmul output.
        self.c_pad = {l: _round_up(self.channels[l], 128) for l in self.layers}

        key = jax.random.PRNGKey(seed)
        self.weights = {}
        for layer in self.layers:
            p = self.strides[layer]
            cin = in_chans * p * p
            cl, cp = self.channels[layer], self.c_pad[layer]
            key, k1, k2, k3, k4 = jax.random.split(key, 5)
            scale = 1.0 / jnp.sqrt(jnp.float32(cin))
            wt = jax.random.normal(k1, (cin, cl), jnp.float32) * scale
            bt = jax.random.normal(k2, (cl,), jnp.float32) * 0.02
            ws = jax.random.normal(k3, (cin, cl), jnp.float32) * scale
            bs = jax.random.normal(k4, (cl,), jnp.float32) * 0.02

            # Fold transforms.Normalize(mean, std) into the embedding:
            #   y = ((x - m)/s) @ W + b  ==  x @ (W/s) + (b - (m/s) @ W)
            mean_vec = jnp.repeat(self.mean, p * p)
            inv_std_vec = jnp.repeat(1.0 / self.std, p * p)

            def fold(w, b):
                return inv_std_vec[:, None] * w, b - (mean_vec * inv_std_vec) @ w

            wt, bt = fold(wt, bt)
            ws, bs = fold(ws, bs)
            wt = jnp.pad(wt, ((0, 0), (0, cp - cl)))
            ws = jnp.pad(ws, ((0, 0), (0, cp - cl)))
            bt = jnp.pad(bt, (0, cp - cl))
            bs = jnp.pad(bs, (0, cp - cl))
            w_cat = jnp.concatenate([wt, ws], axis=1).astype(jnp.bfloat16)
            b_cat = jnp.concatenate([bt, bs]).reshape(1, 2 * cp)
            self.weights[layer] = (w_cat, b_cat)

        self._fwd_eval = jax.jit(functools.partial(self._forward_impl,
                                                   training=False))
        self._fwd_train = jax.jit(functools.partial(self._forward_impl,
                                                    training=True))

    def _forward_impl(self, images, training):
        # bf16 cast fused with patchify (Normalize already folded into weights).
        images = images.astype(jnp.bfloat16)
        B = images.shape[0]
        Ho, Wo = self.input_size
        teacher, student = {}, {}
        amap = jnp.zeros((B, Ho, Wo), jnp.float32)
        scale = 1.0 / float(len(self.layers))
        for layer in self.layers:
            p = self.strides[layer]
            cl, cp = self.channels[layer], self.c_pad[layer]
            w_cat, b_cat = self.weights[layer]

            patches, (Hl, Wl) = _patchify(images, p)
            feats = extract_features(patches, w_cat, b_cat, cp)   # bf16 (M, 2cp)
            feats4 = feats.reshape(B, Hl, Wl, 2 * cp)             # channels on lanes

            if training:
                if self.use_feature_pooler:
                    f = avg_pool_3x3(feats4)
                else:
                    f = feats4.astype(jnp.float32)
                teacher[layer] = f[..., :cl].transpose(0, 3, 1, 2)         # NCHW
                student[layer] = f[..., cp:cp + cl].transpose(0, 3, 1, 2)  # NCHW
            else:
                rh = _bilinear_matrix(Ho, Hl)
                rwt = _bilinear_matrix(Wo, Wl).T
                amap = fused_anomaly_accumulate(
                    feats4, rh, rwt, amap, cp, self.use_feature_pooler, scale)

        if training:
            return teacher, student
        return amap   # == anomaly_map[:, 0, ...] (mean over layers folded in)

    def forward(self, images, training=False):
        return self._fwd_train(images) if training else self._fwd_eval(images)


# ------------------------------------ main -------------------------------------

if __name__ == "__main__":
    key = jax.random.PRNGKey(0)
    images = jax.random.uniform(key, (2, 3, 16, 16), dtype=jnp.float32)

    model = MMRPallas(
        layers=["layer1", "layer2"],
        input_size=(16, 16),
        backbone="wide_resnet50_2",
        patch_size=4,
        in_chans=3,
        embed_dim=32,
        depth=2,
        num_heads=4,
        mlp_ratio=4.0,
        scale_factors=(4.0, 2.0),
        fpn_output_dim=(32, 64),
        use_feature_pooler=True,
        use_tiler=False,
    )

    out = model.forward(images, training=False)
    out = jax.block_until_ready(out)
    assert out.shape == (2, 16, 16), out.shape
    assert bool(jnp.all(jnp.isfinite(out)))
    print("KERNEL_OK")
</pallas_src>

<mosaic_0001>
module attributes {stable_mosaic.version = 11 : i64} {
  func.func private @main(%arg0: i32) attributes {dimension_semantics = [#tpu.dimension_semantics<core_parallel>], iteration_bounds = array<i64: 2>, tpu.core_type = #tpu.core_type<sc_scalar_subcore>, window_params = []} {
    return
  }
}

module attributes {stable_mosaic.version = 11 : i64} {
  func.func private @main(%arg0: i32) attributes {dimension_semantics = [#tpu.dimension_semantics<core_parallel>], iteration_bounds = array<i64: 2>, tpu.core_type = #tpu.core_type<sc_scalar_subcore>, window_params = []} {
    return
  }
}

module attributes {stable_mosaic.version = 11 : i64} {
  func.func @_extract_kernel(%arg0: i32, %arg1: memref<8x192xbf16, #tpu.memory_space<vmem>>, %arg2: memref<192x256xbf16, #tpu.memory_space<vmem>>, %arg3: memref<1x256xf32, #tpu.memory_space<vmem>>, %arg4: memref<8x256xbf16, #tpu.memory_space<vmem>>) attributes {dimension_semantics = [#tpu.dimension_semantics<parallel>], iteration_bounds = array<i64: 1>, scalar_prefetch = 0 : i64, scratch_operands = 0 : i64, tpu.core_type = #tpu.core_type<tc>, window_params = [{transform_indices = @transform_0, window_bounds = array<i64: 8, 192>}, {pipeline_mode = #tpu.pipeline_mode<synchronous>, transform_indices = @transform_1, window_bounds = array<i64: 192, 256>}, {pipeline_mode = #tpu.pipeline_mode<synchronous>, transform_indices = @transform_2, window_bounds = array<i64: 1, 256>}, {transform_indices = @transform_3, window_bounds = array<i64: 8, 256>}]} {
    %c0 = arith.constant 0 : index
    %c0_0 = arith.constant 0 : index
    %0 = vector.load %arg1[%c0, %c0_0] : memref<8x192xbf16, #tpu.memory_space<vmem>>, vector<8x192xbf16>
    %c0_1 = arith.constant 0 : index
    %c0_2 = arith.constant 0 : index
    %1 = vector.load %arg2[%c0_1, %c0_2] : memref<192x256xbf16, #tpu.memory_space<vmem>>, vector<192x256xbf16>
    %cst = arith.constant dense<0.000000e+00> : vector<8x256xf32>
    %2 = tpu.matmul %0, %1, %cst {dimension_numbers = #tpu.dot_dimension_numbers<[1], [0], [0], [1], [0, 0, 1, 1], [], []>} : vector<8x192xbf16>, vector<192x256xbf16>, vector<8x256xf32> -> vector<8x256xf32>
    %c0_3 = arith.constant 0 : index
    %c0_4 = arith.constant 0 : index
    %3 = vector.load %arg3[%c0_3, %c0_4] : memref<1x256xf32, #tpu.memory_space<vmem>>, vector<1x256xf32>
    %4 = vector.broadcast %3 : vector<1x256xf32> to vector<8x256xf32>
    %5 = arith.addf %2, %4 : vector<8x256xf32>
    %6 = vector.extract_strided_slice %5 {offsets = [0, 0], sizes = [8, 128], strides = [1, 1]} : vector<8x256xf32> to vector<8x128xf32>
    %cst_5 = arith.constant 0.000000e+00 : f32
    %7 = vector.broadcast %cst_5 : f32 to vector<8x128xf32>
    %8 = arith.maximumf %6, %7 : vector<8x128xf32>
    %9 = vector.extract_strided_slice %5 {offsets = [0, 128], sizes = [8, 128], strides = [1, 1]} : vector<8x256xf32> to vector<8x128xf32>
    %10 = arith.mulf %9, %9 : vector<8x128xf32>
    %11 = arith.mulf %9, %10 : vector<8x128xf32>
    %cst_6 = arith.constant 4.471500e-02 : f32
    %12 = vector.broadcast %cst_6 : f32 to vector<8x128xf32>
    %13 = arith.mulf %12, %11 : vector<8x128xf32>
    %14 = arith.addf %9, %13 : vector<8x128xf32>
    %cst_7 = arith.constant 0.797884583 : f32
    %15 = vector.broadcast %cst_7 : f32 to vector<8x128xf32>
    %16 = arith.mulf %15, %14 : vector<8x128xf32>
    %17 = math.tanh %16 : vector<8x128xf32>
    %cst_8 = arith.constant 1.000000e+00 : f32
    %18 = vector.broadcast %cst_8 : f32 to vector<8x128xf32>
    %19 = arith.addf %18, %17 : vector<8x128xf32>
    %cst_9 = arith.constant 5.000000e-01 : f32
    %20 = vector.broadcast %cst_9 : f32 to vector<8x128xf32>
    %21 = arith.mulf %20, %19 : vector<8x128xf32>
    %22 = arith.mulf %9, %21 : vector<8x128xf32>
    %23 = arith.truncf %8 : vector<8x128xf32> to vector<8x128xbf16>
    %c0_10 = arith.constant 0 : index
    %c0_11 = arith.constant 0 : index
    %24 = vector.load %arg4[%c0_10, %c0_11] : memref<8x256xbf16, #tpu.memory_space<vmem>>, vector<8x128xbf16>
    tpu.vector_store %arg4[%c0_10, %c0_11], %23 {strides = array<i32>} : memref<8x256xbf16, #tpu.memory_space<vmem>>, vector<8x128xbf16>,
    %25 = arith.truncf %22 : vector<8x128xf32> to vector<8x128xbf16>
    %c0_12 = arith.constant 0 : index
    %c128 = arith.constant 128 : index
    %26 = vector.load %arg4[%c0_12, %c128] : memref<8x256xbf16, #tpu.memory_space<vmem>>, vector<8x128xbf16>
    tpu.vector_store %arg4[%c0_12, %c128], %25 {strides = array<i32>} : memref<8x256xbf16, #tpu.memory_space<vmem>>, vector<8x128xbf16>,
    return
  }
  func.func @transform_0(%arg0: i32) -> (i32, i32) {
    %c0_i32 = arith.constant 0 : i32
    %c0_i32_0 = arith.constant 0 : i32
    return %arg0, %c0_i32 : i32, i32
  }
  func.func @transform_1(%arg0: i32) -> (i32, i32) {
    %c0_i32 = arith.constant 0 : i32
    %c0_i32_0 = arith.constant 0 : i32
    %c0_i32_1 = arith.constant 0 : i32
    return %c0_i32, %c0_i32_0 : i32, i32
  }
  func.func @transform_2(%arg0: i32) -> (i32, i32) {
    %c0_i32 = arith.constant 0 : i32
    %c0_i32_0 = arith.constant 0 : i32
    %c0_i32_1 = arith.constant 0 : i32
    return %c0_i32, %c0_i32_0 : i32, i32
  }
  func.func @transform_3(%arg0: i32) -> (i32, i32) {
    %c0_i32 = arith.constant 0 : i32
    %c0_i32_0 = arith.constant 0 : i32
    return %arg0, %c0_i32 : i32, i32
  }
}

module attributes {stable_mosaic.version = 11 : i64} {
  func.func @_extract_kernel(%arg0: i32, %arg1: memref<32x48xbf16, #tpu.memory_space<vmem>>, %arg2: memref<48x256xbf16, #tpu.memory_space<vmem>>, %arg3: memref<1x256xf32, #tpu.memory_space<vmem>>, %arg4: memref<32x256xbf16, #tpu.memory_space<vmem>>) attributes {dimension_semantics = [#tpu.dimension_semantics<parallel>], iteration_bounds = array<i64: 1>, scalar_prefetch = 0 : i64, scratch_operands = 0 : i64, tpu.core_type = #tpu.core_type<tc>, window_params = [{transform_indices = @transform_0, window_bounds = array<i64: 32, 48>}, {pipeline_mode = #tpu.pipeline_mode<synchronous>, transform_indices = @transform_1, window_bounds = array<i64: 48, 256>}, {pipeline_mode = #tpu.pipeline_mode<synchronous>, transform_indices = @transform_2, window_bounds = array<i64: 1, 256>}, {transform_indices = @transform_3, window_bounds = array<i64: 32, 256>}]} {
    %c0 = arith.constant 0 : index
    %c0_0 = arith.constant 0 : index
    %0 = vector.load %arg1[%c0, %c0_0] : memref<32x48xbf16, #tpu.memory_space<vmem>>, vector<32x48xbf16>
    %c0_1 = arith.constant 0 : index
    %c0_2 = arith.constant 0 : index
    %1 = vector.load %arg2[%c0_1, %c0_2] : memref<48x256xbf16, #tpu.memory_space<vmem>>, vector<48x256xbf16>
    %cst = arith.constant dense<0.000000e+00> : vector<32x256xf32>
    %2 = tpu.matmul %0, %1, %cst {dimension_numbers = #tpu.dot_dimension_numbers<[1], [0], [0], [1], [0, 0, 1, 1], [], []>} : vector<32x48xbf16>, vector<48x256xbf16>, vector<32x256xf32> -> vector<32x256xf32>
    %c0_3 = arith.constant 0 : index
    %c0_4 = arith.constant 0 : index
    %3 = vector.load %arg3[%c0_3, %c0_4] : memref<1x256xf32, #tpu.memory_space<vmem>>, vector<1x256xf32>
    %4 = vector.broadcast %3 : vector<1x256xf32> to vector<32x256xf32>
    %5 = arith.addf %2, %4 : vector<32x256xf32>
    %6 = vector.extract_strided_slice %5 {offsets = [0, 0], sizes = [32, 128], strides = [1, 1]} : vector<32x256xf32> to vector<32x128xf32>
    %cst_5 = arith.constant 0.000000e+00 : f32
    %7 = vector.broadcast %cst_5 : f32 to vector<32x128xf32>
    %8 = arith.maximumf %6, %7 : vector<32x128xf32>
    %9 = vector.extract_strided_slice %5 {offsets = [0, 128], sizes = [32, 128], strides = [1, 1]} : vector<32x256xf32> to vector<32x128xf32>
    %10 = arith.mulf %9, %9 : vector<32x128xf32>
    %11 = arith.mulf %9, %10 : vector<32x128xf32>
    %cst_6 = arith.constant 4.471500e-02 : f32
    %12 = vector.broadcast %cst_6 : f32 to vector<32x128xf32>
    %13 = arith.mulf %12, %11 : vector<32x128xf32>
    %14 = arith.addf %9, %13 : vector<32x128xf32>
    %cst_7 = arith.constant 0.797884583 : f32
    %15 = vector.broadcast %cst_7 : f32 to vector<32x128xf32>
    %16 = arith.mulf %15, %14 : vector<32x128xf32>
    %17 = math.tanh %16 : vector<32x128xf32>
    %cst_8 = arith.constant 1.000000e+00 : f32
    %18 = vector.broadcast %cst_8 : f32 to vector<32x128xf32>
    %19 = arith.addf %18, %17 : vector<32x128xf32>
    %cst_9 = arith.constant 5.000000e-01 : f32
    %20 = vector.broadcast %cst_9 : f32 to vector<32x128xf32>
    %21 = arith.mulf %20, %19 : vector<32x128xf32>
    %22 = arith.mulf %9, %21 : vector<32x128xf32>
    %23 = arith.truncf %8 : vector<32x128xf32> to vector<32x128xbf16>
    %c0_10 = arith.constant 0 : index
    %c0_11 = arith.constant 0 : index
    %24 = vector.load %arg4[%c0_10, %c0_11] : memref<32x256xbf16, #tpu.memory_space<vmem>>, vector<32x128xbf16>
    tpu.vector_store %arg4[%c0_10, %c0_11], %23 {strides = array<i32>} : memref<32x256xbf16, #tpu.memory_space<vmem>>, vector<32x128xbf16>,
    %25 = arith.truncf %22 : vector<32x128xf32> to vector<32x128xbf16>
    %c0_12 = arith.constant 0 : index
    %c128 = arith.constant 128 : index
    %26 = vector.load %arg4[%c0_12, %c128] : memref<32x256xbf16, #tpu.memory_space<vmem>>, vector<32x128xbf16>
    tpu.vector_store %arg4[%c0_12, %c128], %25 {strides = array<i32>} : memref<32x256xbf16, #tpu.memory_space<vmem>>, vector<32x128xbf16>,
    return
  }
  func.func @transform_0(%arg0: i32) -> (i32, i32) {
    %c0_i32 = arith.constant 0 : i32
    %c0_i32_0 = arith.constant 0 : i32
    return %arg0, %c0_i32 : i32, i32
  }
  func.func @transform_1(%arg0: i32) -> (i32, i32) {
    %c0_i32 = arith.constant 0 : i32
    %c0_i32_0 = arith.constant 0 : i32
    %c0_i32_1 = arith.constant 0 : i32
    return %c0_i32, %c0_i32_0 : i32, i32
  }
  func.func @transform_2(%arg0: i32) -> (i32, i32) {
    %c0_i32 = arith.constant 0 : i32
    %c0_i32_0 = arith.constant 0 : i32
    %c0_i32_1 = arith.constant 0 : i32
    return %c0_i32, %c0_i32_0 : i32, i32
  }
  func.func @transform_3(%arg0: i32) -> (i32, i32) {
    %c0_i32 = arith.constant 0 : i32
    %c0_i32_0 = arith.constant 0 : i32
    return %arg0, %c0_i32 : i32, i32
  }
}

module attributes {stable_mosaic.version = 11 : i64} {
  func.func @_fused_map_kernel(%arg0: i32, %arg1: memref<1x2x2x256xbf16, #tpu.memory_space<vmem>>, %arg2: memref<16x2xf32, #tpu.memory_space<vmem>>, %arg3: memref<2x16xf32, #tpu.memory_space<vmem>>, %arg4: memref<1x16x16xf32, #tpu.memory_space<vmem>>, %arg5: memref<1x16x16xf32, #tpu.memory_space<vmem>>, %arg6: memref<1x4x4x256xf32, #tpu.memory_space<vmem>>) attributes {dimension_semantics = [#tpu.dimension_semantics<parallel>], iteration_bounds = array<i64: 2>, scalar_prefetch = 0 : i64, scratch_operands = 1 : i64, tpu.core_type = #tpu.core_type<tc>, window_params = [{transform_indices = @transform_0, window_bounds = array<i64: 1, 2, 2, 256>}, {pipeline_mode = #tpu.pipeline_mode<synchronous>, transform_indices = @transform_1, window_bounds = array<i64: 16, 2>}, {pipeline_mode = #tpu.pipeline_mode<synchronous>, transform_indices = @transform_2, window_bounds = array<i64: 2, 16>}, {transform_indices = @transform_3, window_bounds = array<i64: 1, 16, 16>}, {transform_indices = @transform_4, window_bounds = array<i64: 1, 16, 16>}]} {
    %c0 = arith.constant 0 : index
    %c0_0 = arith.constant 0 : index
    %c0_1 = arith.constant 0 : index
    %c0_2 = arith.constant 0 : index
    %0 = vector.load %arg1[%c0, %c0_0, %c0_1, %c0_2] : memref<1x2x2x256xbf16, #tpu.memory_space<vmem>>, vector<1x2x2x256xbf16>
    %1 = arith.extf %0 : vector<1x2x2x256xbf16> to vector<1x2x2x256xf32>
    %cst = arith.constant 0.000000e+00 : f32
    %2 = vector.broadcast %cst : f32 to vector<1x4x4x256xf32>
    %c0_3 = arith.constant 0 : index
    %c0_4 = arith.constant 0 : index
    %c0_5 = arith.constant 0 : index
    %c0_6 = arith.constant 0 : index
    %3 = vector.load %arg6[%c0_3, %c0_4, %c0_5, %c0_6] : memref<1x4x4x256xf32, #tpu.memory_space<vmem>>, vector<1x4x4x256xf32>
    tpu.vector_store %arg6[%c0_3, %c0_4, %c0_5, %c0_6], %2 {strides = array<i32>} : memref<1x4x4x256xf32, #tpu.memory_space<vmem>>, vector<1x4x4x256xf32>,
    %c0_7 = arith.constant 0 : index
    %c1 = arith.constant 1 : index
    %c1_8 = arith.constant 1 : index
    %c0_9 = arith.constant 0 : index
    %4 = vector.load %arg6[%c0_7, %c1, %c1_8, %c0_9] : memref<1x4x4x256xf32, #tpu.memory_space<vmem>>, vector<1x2x2x256xf32>
    tpu.vector_store %arg6[%c0_7, %c1, %c1_8, %c0_9], %1 {strides = array<i32>} : memref<1x4x4x256xf32, #tpu.memory_space<vmem>>, vector<1x2x2x256xf32>,
    %c0_10 = arith.constant 0 : index
    %c0_11 = arith.constant 0 : index
    %c0_12 = arith.constant 0 : index
    %c0_13 = arith.constant 0 : index
    %5 = vector.load %arg6[%c0_10, %c0_11, %c0_12, %c0_13] : memref<1x4x4x256xf32, #tpu.memory_space<vmem>>, vector<1x2x4x256xf32>
    %c0_14 = arith.constant 0 : index
    %c1_15 = arith.constant 1 : index
    %c0_16 = arith.constant 0 : index
    %c0_17 = arith.constant 0 : index
    %6 = vector.load %arg6[%c0_14, %c1_15, %c0_16, %c0_17] : memref<1x4x4x256xf32, #tpu.memory_space<vmem>>, vector<1x2x4x256xf32>
    %7 = arith.addf %5, %6 : vector<1x2x4x256xf32>
    %c0_18 = arith.constant 0 : index
    %c2 = arith.constant 2 : index
    %c0_19 = arith.constant 0 : index
    %c0_20 = arith.constant 0 : index
    %8 = vector.load %arg6[%c0_18, %c2, %c0_19, %c0_20] : memref<1x4x4x256xf32, #tpu.memory_space<vmem>>, vector<1x2x4x256xf32>
    %9 = arith.addf %7, %8 : vector<1x2x4x256xf32>
    %c0_21 = arith.constant 0 : index
    %c0_22 = arith.constant 0 : index
    %c0_23 = arith.constant 0 : index
    %c0_24 = arith.constant 0 : index
    %10 = vector.load %arg6[%c0_21, %c0_22, %c0_23, %c0_24] : memref<1x4x4x256xf32, #tpu.memory_space<vmem>>, vector<1x2x4x256xf32>
    tpu.vector_store %arg6[%c0_21, %c0_22, %c0_23, %c0_24], %9 {strides = array<i32>} : memref<1x4x4x256xf32, #tpu.memory_space<vmem>>, vector<1x2x4x256xf32>,
    %c0_25 = arith.constant 0 : index
    %c0_26 = arith.constant 0 : index
    %c0_27 = arith.constant 0 : index
    %c0_28 = arith.constant 0 : index
    %11 = vector.load %arg6[%c0_25, %c0_26, %c0_27, %c0_28] : memref<1x4x4x256xf32, #tpu.memory_space<vmem>>, vector<1x2x2x256xf32>
    %c0_29 = arith.constant 0 : index
    %c0_30 = arith.constant 0 : index
    %c1_31 = arith.constant 1 : index
    %c0_32 = arith.constant 0 : index
    %12 = vector.load %arg6[%c0_29, %c0_30, %c1_31, %c0_32] : memref<1x4x4x256xf32, #tpu.memory_space<vmem>>, vector<1x2x2x256xf32>
    %13 = arith.addf %11, %12 : vector<1x2x2x256xf32>
    %c0_33 = arith.constant 0 : index
    %c0_34 = arith.constant 0 : index
    %c2_35 = arith.constant 2 : index
    %c0_36 = arith.constant 0 : index
    %14 = vector.load %arg6[%c0_33, %c0_34, %c2_35, %c0_36] : memref<1x4x4x256xf32, #tpu.memory_space<vmem>>, vector<1x2x2x256xf32>
    %15 = arith.addf %13, %14 : vector<1x2x2x256xf32>
    %cst_37 = arith.constant 0.111111112 : f32
    %16 = vector.broadcast %cst_37 : f32 to vector<1x2x2x256xf32>
    %17 = arith.mulf %15, %16 : vector<1x2x2x256xf32>
    %18 = vector.extract_strided_slice %17 {offsets = [0, 0, 0, 0], sizes = [1, 2, 2, 128], strides = [1, 1, 1, 1]} : vector<1x2x2x256xf32> to vector<1x2x2x128xf32>
    %19 = vector.extract_strided_slice %17 {offsets = [0, 0, 0, 128], sizes = [1, 2, 2, 128], strides = [1, 1, 1, 1]} : vector<1x2x2x256xf32> to vector<1x2x2x128xf32>
    %20 = arith.mulf %18, %19 : vector<1x2x2x128xf32>
    %cst_38 = arith.constant dense<0.000000e+00> : vector<1x2x2xf32>
    %21 = vector.multi_reduction <add>, %20, %cst_38 [3] : vector<1x2x2x128xf32> to vector<1x2x2xf32>
    %22 = arith.mulf %18, %18 : vector<1x2x2x128xf32>
    %cst_39 = arith.constant dense<0.000000e+00> : vector<1x2x2xf32>
    %23 = vector.multi_reduction <add>, %22, %cst_39 [3] : vector<1x2x2x128xf32> to vector<1x2x2xf32>
    %24 = arith.mulf %19, %19 : vector<1x2x2x128xf32>
    %cst_40 = arith.constant dense<0.000000e+00> : vector<1x2x2xf32>
    %25 = vector.multi_reduction <add>, %24, %cst_40 [3] : vector<1x2x2x128xf32> to vector<1x2x2xf32>
    %cst_41 = arith.constant 1.000000e-16 : f32
    %26 = vector.broadcast %cst_41 : f32 to vector<1x2x2xf32>
    %27 = arith.maximumf %23, %26 : vector<1x2x2xf32>
    %28 = math.rsqrt %27 : vector<1x2x2xf32>
    %29 = arith.mulf %21, %28 : vector<1x2x2xf32>
    %cst_42 = arith.constant 1.000000e-16 : f32
    %30 = vector.broadcast %cst_42 : f32 to vector<1x2x2xf32>
    %31 = arith.maximumf %25, %30 : vector<1x2x2xf32>
    %32 = math.rsqrt %31 : vector<1x2x2xf32>
    %33 = arith.mulf %29, %32 : vector<1x2x2xf32>
    %cst_43 = arith.constant 1.000000e+00 : f32
    %34 = vector.broadcast %cst_43 : f32 to vector<1x2x2xf32>
    %35 = arith.subf %34, %33 : vector<1x2x2xf32>
    %36 = vector.shape_cast %35 : vector<1x2x2xf32> to vector<2x2xf32>
    %c0_44 = arith.constant 0 : index
    %c0_45 = arith.constant 0 : index
    %37 = vector.load %arg2[%c0_44, %c0_45] : memref<16x2xf32, #tpu.memory_space<vmem>>, vector<16x2xf32>
    %cst_46 = arith.constant dense<0.000000e+00> : vector<16x2xf32>
    %38 = tpu.matmul %37, %36, %cst_46 {dimension_numbers = #tpu.dot_dimension_numbers<[1], [0], [0], [1], [0, 0, 1, 1], [], []>} : vector<16x2xf32>, vector<2x2xf32>, vector<16x2xf32> -> vector<16x2xf32>
    %c0_47 = arith.constant 0 : index
    %c0_48 = arith.constant 0 : index
    %39 = vector.load %arg3[%c0_47, %c0_48] : memref<2x16xf32, #tpu.memory_space<vmem>>, vector<2x16xf32>
    %cst_49 = arith.constant dense<0.000000e+00> : vector<16x16xf32>
    %40 = tpu.matmul %38, %39, %cst_49 {dimension_numbers = #tpu.dot_dimension_numbers<[1], [0], [0], [1], [0, 0, 1, 1], [], []>} : vector<16x2xf32>, vector<2x16xf32>, vector<16x16xf32> -> vector<16x16xf32>
    %c0_50 = arith.constant 0 : index
    %c0_51 = arith.constant 0 : index
    %c0_52 = arith.constant 0 : index
    %41 = vector.load %arg4[%c0_50, %c0_51, %c0_52] : memref<1x16x16xf32, #tpu.memory_space<vmem>>, vector<1x16x16xf32>
    %cst_53 = arith.constant 5.000000e-01 : f32
    %42 = vector.broadcast %cst_53 : f32 to vector<16x16xf32>
    %43 = arith.mulf %42, %40 : vector<16x16xf32>
    %44 = vector.shape_cast %43 : vector<16x16xf32> to vector<1x16x16xf32>
    %45 = arith.addf %41, %44 : vector<1x16x16xf32>
    %c0_54 = arith.constant 0 : index
    %c0_55 = arith.constant 0 : index
    %c0_56 = arith.constant 0 : index
    %46 = vector.load %arg5[%c0_54, %c0_55, %c0_56] : memref<1x16x16xf32, #tpu.memory_space<vmem>>, vector<1x16x16xf32>
    tpu.vector_store %arg5[%c0_54, %c0_55, %c0_56], %45 {strides = array<i32>} : memref<1x16x16xf32, #tpu.memory_space<vmem>>, vector<1x16x16xf32>,
    return
  }
  func.func @transform_0(%arg0: i32) -> (i32, i32, i32, i32) {
    %c0_i32 = arith.constant 0 : i32
    %c0_i32_0 = arith.constant 0 : i32
    %c0_i32_1 = arith.constant 0 : i32
    %c0_i32_2 = arith.constant 0 : i32
    return %arg0, %c0_i32, %c0_i32_0, %c0_i32_1 : i32, i32, i32, i32
  }
  func.func @transform_1(%arg0: i32) -> (i32, i32) {
    %c0_i32 = arith.constant 0 : i32
    %c0_i32_0 = arith.constant 0 : i32
    %c0_i32_1 = arith.constant 0 : i32
    return %c0_i32, %c0_i32_0 : i32, i32
  }
  func.func @transform_2(%arg0: i32) -> (i32, i32) {
    %c0_i32 = arith.constant 0 : i32
    %c0_i32_0 = arith.constant 0 : i32
    %c0_i32_1 = arith.constant 0 : i32
    return %c0_i32, %c0_i32_0 : i32, i32
  }
  func.func @transform_3(%arg0: i32) -> (i32, i32, i32) {
    %c0_i32 = arith.constant 0 : i32
    %c0_i32_0 = arith.constant 0 : i32
    %c0_i32_1 = arith.constant 0 : i32
    return %arg0, %c0_i32, %c0_i32_0 : i32, i32, i32
  }
  func.func @transform_4(%arg0: i32) -> (i32, i32, i32) {
    %c0_i32 = arith.constant 0 : i32
    %c0_i32_0 = arith.constant 0 : i32
    %c0_i32_1 = arith.constant 0 : i32
    return %arg0, %c0_i32, %c0_i32_0 : i32, i32, i32
  }
}

module attributes {stable_mosaic.version = 11 : i64} {
  func.func @_fused_map_kernel(%arg0: i32, %arg1: memref<1x4x4x256xbf16, #tpu.memory_space<vmem>>, %arg2: memref<16x4xf32, #tpu.memory_space<vmem>>, %arg3: memref<4x16xf32, #tpu.memory_space<vmem>>, %arg4: memref<1x16x16xf32, #tpu.memory_space<vmem>>, %arg5: memref<1x16x16xf32, #tpu.memory_space<vmem>>, %arg6: memref<1x6x6x256xf32, #tpu.memory_space<vmem>>) attributes {dimension_semantics = [#tpu.dimension_semantics<parallel>], iteration_bounds = array<i64: 2>, scalar_prefetch = 0 : i64, scratch_operands = 1 : i64, tpu.core_type = #tpu.core_type<tc>, window_params = [{transform_indices = @transform_0, window_bounds = array<i64: 1, 4, 4, 256>}, {pipeline_mode = #tpu.pipeline_mode<synchronous>, transform_indices = @transform_1, window_bounds = array<i64: 16, 4>}, {pipeline_mode = #tpu.pipeline_mode<synchronous>, transform_indices = @transform_2, window_bounds = array<i64: 4, 16>}, {transform_indices = @transform_3, window_bounds = array<i64: 1, 16, 16>}, {transform_indices = @transform_4, window_bounds = array<i64: 1, 16, 16>}]} {
    %c0 = arith.constant 0 : index
    %c0_0 = arith.constant 0 : index
    %c0_1 = arith.constant 0 : index
    %c0_2 = arith.constant 0 : index
    %0 = vector.load %arg1[%c0, %c0_0, %c0_1, %c0_2] : memref<1x4x4x256xbf16, #tpu.memory_space<vmem>>, vector<1x4x4x256xbf16>
    %1 = arith.extf %0 : vector<1x4x4x256xbf16> to vector<1x4x4x256xf32>
    %cst = arith.constant 0.000000e+00 : f32
    %2 = vector.broadcast %cst : f32 to vector<1x6x6x256xf32>
    %c0_3 = arith.constant 0 : index
    %c0_4 = arith.constant 0 : index
    %c0_5 = arith.constant 0 : index
    %c0_6 = arith.constant 0 : index
    %3 = vector.load %arg6[%c0_3, %c0_4, %c0_5, %c0_6] : memref<1x6x6x256xf32, #tpu.memory_space<vmem>>, vector<1x6x6x256xf32>
    tpu.vector_store %arg6[%c0_3, %c0_4, %c0_5, %c0_6], %2 {strides = array<i32>} : memref<1x6x6x256xf32, #tpu.memory_space<vmem>>, vector<1x6x6x256xf32>,
    %c0_7 = arith.constant 0 : index
    %c1 = arith.constant 1 : index
    %c1_8 = arith.constant 1 : index
    %c0_9 = arith.constant 0 : index
    %4 = vector.load %arg6[%c0_7, %c1, %c1_8, %c0_9] : memref<1x6x6x256xf32, #tpu.memory_space<vmem>>, vector<1x4x4x256xf32>
    tpu.vector_store %arg6[%c0_7, %c1, %c1_8, %c0_9], %1 {strides = array<i32>} : memref<1x6x6x256xf32, #tpu.memory_space<vmem>>, vector<1x4x4x256xf32>,
    %c0_10 = arith.constant 0 : index
    %c0_11 = arith.constant 0 : index
    %c0_12 = arith.constant 0 : index
    %c0_13 = arith.constant 0 : index
    %5 = vector.load %arg6[%c0_10, %c0_11, %c0_12, %c0_13] : memref<1x6x6x256xf32, #tpu.memory_space<vmem>>, vector<1x4x6x256xf32>
    %c0_14 = arith.constant 0 : index
    %c1_15 = arith.constant 1 : index
    %c0_16 = arith.constant 0 : index
    %c0_17 = arith.constant 0 : index
    %6 = vector.load %arg6[%c0_14, %c1_15, %c0_16, %c0_17] : memref<1x6x6x256xf32, #tpu.memory_space<vmem>>, vector<1x4x6x256xf32>
    %7 = arith.addf %5, %6 : vector<1x4x6x256xf32>
    %c0_18 = arith.constant 0 : index
    %c2 = arith.constant 2 : index
    %c0_19 = arith.constant 0 : index
    %c0_20 = arith.constant 0 : index
    %8 = vector.load %arg6[%c0_18, %c2, %c0_19, %c0_20] : memref<1x6x6x256xf32, #tpu.memory_space<vmem>>, vector<1x4x6x256xf32>
    %9 = arith.addf %7, %8 : vector<1x4x6x256xf32>
    %c0_21 = arith.constant 0 : index
    %c0_22 = arith.constant 0 : index
    %c0_23 = arith.constant 0 : index
    %c0_24 = arith.constant 0 : index
    %10 = vector.load %arg6[%c0_21, %c0_22, %c0_23, %c0_24] : memref<1x6x6x256xf32, #tpu.memory_space<vmem>>, vector<1x4x6x256xf32>
    tpu.vector_store %arg6[%c0_21, %c0_22, %c0_23, %c0_24], %9 {strides = array<i32>} : memref<1x6x6x256xf32, #tpu.memory_space<vmem>>, vector<1x4x6x256xf32>,
    %c0_25 = arith.constant 0 : index
    %c0_26 = arith.constant 0 : index
    %c0_27 = arith.constant 0 : index
    %c0_28 = arith.constant 0 : index
    %11 = vector.load %arg6[%c0_25, %c0_26, %c0_27, %c0_28] : memref<1x6x6x256xf32, #tpu.memory_space<vmem>>, vector<1x4x4x256xf32>
    %c0_29 = arith.constant 0 : index
    %c0_30 = arith.constant 0 : index
    %c1_31 = arith.constant 1 : index
    %c0_32 = arith.constant 0 : index
    %12 = vector.load %arg6[%c0_29, %c0_30, %c1_31, %c0_32] : memref<1x6x6x256xf32, #tpu.memory_space<vmem>>, vector<1x4x4x256xf32>
    %13 = arith.addf %11, %12 : vector<1x4x4x256xf32>
    %c0_33 = arith.constant 0 : index
    %c0_34 = arith.constant 0 : index
    %c2_35 = arith.constant 2 : index
    %c0_36 = arith.constant 0 : index
    %14 = vector.load %arg6[%c0_33, %c0_34, %c2_35, %c0_36] : memref<1x6x6x256xf32, #tpu.memory_space<vmem>>, vector<1x4x4x256xf32>
    %15 = arith.addf %13, %14 : vector<1x4x4x256xf32>
    %cst_37 = arith.constant 0.111111112 : f32
    %16 = vector.broadcast %cst_37 : f32 to vector<1x4x4x256xf32>
    %17 = arith.mulf %15, %16 : vector<1x4x4x256xf32>
    %18 = vector.extract_strided_slice %17 {offsets = [0, 0, 0, 0], sizes = [1, 4, 4, 128], strides = [1, 1, 1, 1]} : vector<1x4x4x256xf32> to vector<1x4x4x128xf32>
    %19 = vector.extract_strided_slice %17 {offsets = [0, 0, 0, 128], sizes = [1, 4, 4, 128], strides = [1, 1, 1, 1]} : vector<1x4x4x256xf32> to vector<1x4x4x128xf32>
    %20 = arith.mulf %18, %19 : vector<1x4x4x128xf32>
    %cst_38 = arith.constant dense<0.000000e+00> : vector<1x4x4xf32>
    %21 = vector.multi_reduction <add>, %20, %cst_38 [3] : vector<1x4x4x128xf32> to vector<1x4x4xf32>
    %22 = arith.mulf %18, %18 : vector<1x4x4x128xf32>
    %cst_39 = arith.constant dense<0.000000e+00> : vector<1x4x4xf32>
    %23 = vector.multi_reduction <add>, %22, %cst_39 [3] : vector<1x4x4x128xf32> to vector<1x4x4xf32>
    %24 = arith.mulf %19, %19 : vector<1x4x4x128xf32>
    %cst_40 = arith.constant dense<0.000000e+00> : vector<1x4x4xf32>
    %25 = vector.multi_reduction <add>, %24, %cst_40 [3] : vector<1x4x4x128xf32> to vector<1x4x4xf32>
    %cst_41 = arith.constant 1.000000e-16 : f32
    %26 = vector.broadcast %cst_41 : f32 to vector<1x4x4xf32>
    %27 = arith.maximumf %23, %26 : vector<1x4x4xf32>
    %28 = math.rsqrt %27 : vector<1x4x4xf32>
    %29 = arith.mulf %21, %28 : vector<1x4x4xf32>
    %cst_42 = arith.constant 1.000000e-16 : f32
    %30 = vector.broadcast %cst_42 : f32 to vector<1x4x4xf32>
    %31 = arith.maximumf %25, %30 : vector<1x4x4xf32>
    %32 = math.rsqrt %31 : vector<1x4x4xf32>
    %33 = arith.mulf %29, %32 : vector<1x4x4xf32>
    %cst_43 = arith.constant 1.000000e+00 : f32
    %34 = vector.broadcast %cst_43 : f32 to vector<1x4x4xf32>
    %35 = arith.subf %34, %33 : vector<1x4x4xf32>
    %36 = vector.shape_cast %35 : vector<1x4x4xf32> to vector<4x4xf32>
    %c0_44 = arith.constant 0 : index
    %c0_45 = arith.constant 0 : index
    %37 = vector.load %arg2[%c0_44, %c0_45] : memref<16x4xf32, #tpu.memory_space<vmem>>, vector<16x4xf32>
    %cst_46 = arith.constant dense<0.000000e+00> : vector<16x4xf32>
    %38 = tpu.matmul %37, %36, %cst_46 {dimension_numbers = #tpu.dot_dimension_numbers<[1], [0], [0], [1], [0, 0, 1, 1], [], []>} : vector<16x4xf32>, vector<4x4xf32>, vector<16x4xf32> -> vector<16x4xf32>
    %c0_47 = arith.constant 0 : index
    %c0_48 = arith.constant 0 : index
    %39 = vector.load %arg3[%c0_47, %c0_48] : memref<4x16xf32, #tpu.memory_space<vmem>>, vector<4x16xf32>
    %cst_49 = arith.constant dense<0.000000e+00> : vector<16x16xf32>
    %40 = tpu.matmul %38, %39, %cst_49 {dimension_numbers = #tpu.dot_dimension_numbers<[1], [0], [0], [1], [0, 0, 1, 1], [], []>} : vector<16x4xf32>, vector<4x16xf32>, vector<16x16xf32> -> vector<16x16xf32>
    %c0_50 = arith.constant 0 : index
    %c0_51 = arith.constant 0 : index
    %c0_52 = arith.constant 0 : index
    %41 = vector.load %arg4[%c0_50, %c0_51, %c0_52] : memref<1x16x16xf32, #tpu.memory_space<vmem>>, vector<1x16x16xf32>
    %cst_53 = arith.constant 5.000000e-01 : f32
    %42 = vector.broadcast %cst_53 : f32 to vector<16x16xf32>
    %43 = arith.mulf %42, %40 : vector<16x16xf32>
    %44 = vector.shape_cast %43 : vector<16x16xf32> to vector<1x16x16xf32>
    %45 = arith.addf %41, %44 : vector<1x16x16xf32>
    %c0_54 = arith.constant 0 : index
    %c0_55 = arith.constant 0 : index
    %c0_56 = arith.constant 0 : index
    %46 = vector.load %arg5[%c0_54, %c0_55, %c0_56] : memref<1x16x16xf32, #tpu.memory_space<vmem>>, vector<1x16x16xf32>
    tpu.vector_store %arg5[%c0_54, %c0_55, %c0_56], %45 {strides = array<i32>} : memref<1x16x16xf32, #tpu.memory_space<vmem>>, vector<1x16x16xf32>,
    return
  }
  func.func @transform_0(%arg0: i32) -> (i32, i32, i32, i32) {
    %c0_i32 = arith.constant 0 : i32
    %c0_i32_0 = arith.constant 0 : i32
    %c0_i32_1 = arith.constant 0 : i32
    %c0_i32_2 = arith.constant 0 : i32
    return %arg0, %c0_i32, %c0_i32_0, %c0_i32_1 : i32, i32, i32, i32
  }
  func.func @transform_1(%arg0: i32) -> (i32, i32) {
    %c0_i32 = arith.constant 0 : i32
    %c0_i32_0 = arith.constant 0 : i32
    %c0_i32_1 = arith.constant 0 : i32
    return %c0_i32, %c0_i32_0 : i32, i32
  }
  func.func @transform_2(%arg0: i32) -> (i32, i32) {
    %c0_i32 = arith.constant 0 : i32
    %c0_i32_0 = arith.constant 0 : i32
    %c0_i32_1 = arith.constant 0 : i32
    return %c0_i32, %c0_i32_0 : i32, i32
  }
  func.func @transform_3(%arg0: i32) -> (i32, i32, i32) {
    %c0_i32 = arith.constant 0 : i32
    %c0_i32_0 = arith.constant 0 : i32
    %c0_i32_1 = arith.constant 0 : i32
    return %arg0, %c0_i32, %c0_i32_0 : i32, i32, i32
  }
  func.func @transform_4(%arg0: i32) -> (i32, i32, i32) {
    %c0_i32 = arith.constant 0 : i32
    %c0_i32_0 = arith.constant 0 : i32
    %c0_i32_1 = arith.constant 0 : i32
    return %arg0, %c0_i32, %c0_i32_0 : i32, i32, i32
  }
}

</mosaic_0001>

<bundles_post_ra>
// kernel: _forward_impl.6
= control target key start
LH: loop header
LB: loop body
LE: loop exit
PB: predicated region body
PF: predicated region fallthrough
CT: control target
= control target key end

     0   :  { %vm178_vm0 = vcmask 523264   ;;  %v42_v27 = vlaneseq  ;;  %s414_s1 = inlined_call_operand.vmem [shape: bf16[192,256], index: 1, kind: input, shape index: {}]   ;;  %s415_s0 = inlined_call_operand.vmem [shape: bf16[8,192], index: 0, kind: input, shape index: {}]   ;;  %s416_s2 = inlined_call_operand.vmem [shape: f32[1,256], index: 2, kind: input, shape index: {}]   ;;  %s417_s3 = inlined_call_operand.vmem [shape: bf16[8,256], index: 3, kind: output, shape index: {}]  }
   0x1   :  { %v273_v0 = vld [vmem:[%s414_s1 + $0x4] ss:$8 sps:$4 sm:$0xff]   ;;  %v275_v1 = vld [vmem:[%s414_s1] ss:$8 sps:$4 sm:$0xff]   ;;  %v276_v2 = vld [vmem:[%s414_s1 + $0x14] ss:$8 sps:$4 sm:$0xff]  }
   0x2   :  { %182 = vmatprep.subr.bf16.mxu0 %v273_v0  ;;  %v278_v3 = vld [vmem:[%s414_s1 + $0x10] ss:$8 sps:$4 sm:$0xff]   ;;  %v279_v4 = vld [vmem:[%s414_s1 + $0x24] ss:$8 sps:$4 sm:$0xff]   ;;  %v281_v5 = vld [vmem:[%s414_s1 + $0x20] ss:$8 sps:$4 sm:$0xff]  }
   0x3   :  { %183 = vmatpush1.bf16.msra.mxu0 %v275_v1  ;;  %v282_v6 = vld [vmem:[%s414_s1 + $0x34] ss:$8 sps:$4 sm:$0xff]   ;;  %v284_v7 = vld [vmem:[%s414_s1 + $0x30] ss:$8 sps:$4 sm:$0xff]   ;;  %v285_v8 = vld [vmem:[%s414_s1 + $0x44] ss:$8 sps:$4 sm:$0xff]  }
   0x4   :  { %184 = vmatprep.subr.bf16.mxu0 %v276_v2  ;;  %v287_v9 = vld [vmem:[%s414_s1 + $0x40] ss:$8 sps:$4 sm:$0xff]   ;;  %v288_v10 = vld [vmem:[%s414_s1 + $0x54] ss:$8 sps:$4 sm:$0xff]   ;;  %v290_v13 = vld [vmem:[%s414_s1 + $0x50] ss:$8 sps:$4 sm:$0xff]  }
   0x5   :  { %v15_v11 = vld [vmem:[%s415_s0] sm:$0xff]  ;;  %v294_v16 = vld [vmem:[%s414_s1 + $0x74] ss:$8 sps:$4 sm:$0xff]   ;;  %v296_v17 = vld [vmem:[%s414_s1 + $0x70] ss:$8 sps:$4 sm:$0xff]   ;;  %v43_v28 = vshrl.u32 %v42_v27, 7 }
   0x6   :  { %v242_v12 = vcombine.high %v15_v11, %v15_v11  ;;  %v291_v14 = vld [vmem:[%s414_s1 + $0x64] ss:$8 sps:$4 sm:$0xff]   ;;  %v293_v15 = vld [vmem:[%s414_s1 + $0x60] ss:$8 sps:$4 sm:$0xff]   ;;  %v300_v20 = vld [vmem:[%s414_s1 + $0x94] ss:$8 sps:$4 sm:$0xff]   ;;  %v241_v26 = vcombine.low %v15_v11, %v15_v11 }
   0x7   :  { %185 = vmatpush1.bf16.msra.mxu0 %v278_v3  ;;  %v297_v18 = vld [vmem:[%s414_s1 + $0x84] ss:$8 sps:$4 sm:$0xff]   ;;  %v299_v19 = vld [vmem:[%s414_s1 + $0x80] ss:$8 sps:$4 sm:$0xff]   ;;  %v302_v21 = vld [vmem:[%s414_s1 + $0x90] ss:$8 sps:$4 sm:$0xff]  }
   0x8   :  { %186 = vmatprep.subr.bf16.mxu0 %v279_v4  ;;  %267 = vmatprep.mubr.msk.bf16.mxu0 %vm178_vm0, %v242_v12  ;;  %v303_v22 = vld [vmem:[%s414_s1 + $0xa4] ss:$8 sps:$4 sm:$0xff]   ;;  %v305_v23 = vld [vmem:[%s414_s1 + $0xa0] ss:$8 sps:$4 sm:$0xff]   ;;  %v306_v24 = vld [vmem:[%s414_s1 + $0xb4] ss:$8 sps:$4 sm:$0xff]  }
   0x9   :  { %v308_v25 = vld [vmem:[%s414_s1 + $0xb0] ss:$8 sps:$4 sm:$0xff]   ;;  %v48_v29 = vsub.s32 1, %v43_v28  ;;  %v40_v30 = vld [vmem:[%s416_s2] sm:$0x3]  ;;  %v44_v42 = vsub.s32 0, %v43_v28 }
   0xb   :  { %187 = vmatpush1.bf16.msra.mxu0 %v281_v5  ;;  %v49_v31 = vrot.slane %v40_v30, %v48_v29  ;;  %v45_v43 = vrot.slane %v40_v30, %v44_v42 }
   0xc   :  { %188 = vmatprep.subr.bf16.mxu0 %v282_v6 }
   0xf   :  { %189 = vmatpush1.bf16.msra.mxu0 %v284_v7 }
  0x10   :  { %190 = vmatprep.subr.bf16.mxu0 %v285_v8 }
  0x13   :  { %191 = vmatpush1.bf16.msra.mxu0 %v287_v9 }
  0x14   :  { %192 = vmatprep.subr.bf16.mxu0 %v288_v10 }
  0x17   :  { %193 = vmatpush1.bf16.msra.mxu0 %v290_v13 }
  0x18   :  { %194 = vmatprep.subr.bf16.mxu0 %v291_v14 }
  0x1b   :  { %195 = vmatpush1.bf16.msra.mxu0 %v293_v15 }
  0x1c   :  { %196 = vmatprep.subr.bf16.mxu0 %v294_v16 }
  0x1f   :  { %197 = vmatpush1.bf16.msra.mxu0 %v296_v17 }
  0x20   :  { %198 = vmatprep.subr.bf16.mxu0 %v297_v18 }
  0x23   :  { %199 = vmatpush1.bf16.msra.mxu0 %v299_v19 }
  0x24   :  { %200 = vmatprep.subr.bf16.mxu0 %v300_v20 }
  0x27   :  { %201 = vmatpush1.bf16.msra.mxu0 %v302_v21 }
  0x28   :  { %202 = vmatprep.subr.bf16.mxu0 %v303_v22 }
  0x2b   :  { %203 = vmatpush1.bf16.msra.mxu0 %v305_v23 }
  0x2c   :  { %204 = vmatprep.subr.bf16.mxu0 %v306_v24 }
  0x2f   :  { %205 = vmatpush1.bf16.msra.mxu0 %v308_v25 }
  0x32   :  { %215 = vmatmul.mubr.bf16.vlgmr.msra.gmra.mrb[0].mxu0 %v241_v26 }
 0x105   :  { %v216_v32 = vpop.f32.mrb[0].mxu0 }
 0x106   :  { %v218_v33 = vpop.f32.mrb[1].mxu0  ;;  %v217_v45 = vadd.f32 %v216_v32, %v45_v43 }
 0x107   :  { %v219_v34 = vadd.f32 %v218_v33, %v49_v31  ;;  %v220_v35 = vpop.f32.mrb[2].mxu0 }
 0x108   :  { %v221_v36 = vpop.f32.mrb[3].mxu0  ;;  %v223_v48 = vmax.f32 %v217_v45, 0.0 }
 0x109   :  { %v224_v37 = vmul.f32 %v219_v34, %v219_v34 }
 0x10b   :  { %v225_v38 = vmul.f32 %v224_v37, %v219_v34 }
 0x10d   :  { %v226_v39 = vmul.f32 0.044715, %v225_v38 }
 0x10f   :  { %v227_v40 = vadd.f32 %v226_v39, %v219_v34 }
 0x111   :  { %v228_v41 = vmul.f32 0.7978846, %v227_v40 }
 0x113   :  { %311 = vtanh.f32 %v228_v41 }
 0x11d   :  { %v312_v44 = vpop.eup %311 }
 0x11e   :  { %v230_v46 = vadd.f32 1.0, %v312_v44 }
 0x120   :  { %v231_v47 = vmul.f32 0.5, %v230_v46 }
 0x122   :  { %v232_v49 = vmul.f32 %v231_v47, %v219_v34 }
 0x124   :  { %v271_v50 = vpack.c.bf16 %v232_v49, %v223_v48 }
 0x126   :  { %272 = vst [vmem:[%s417_s3] sm:$0xff] %v271_v50  }

// kernel: _forward_impl.4
= control target key start
LH: loop header
LB: loop body
LE: loop exit
PB: predicated region body
PF: predicated region fallthrough
CT: control target
= control target key end

     0   :  { %v273_v1 = vmov 0   ;;  %vm77_vm0 = vcmask 392192   ;;  %v27_v9 = vlaneseq  ;;  %s345_s1 = inlined_call_operand.vmem [shape: bf16[48,256], index: 1, kind: input, shape index: {}]   ;;  %s346_s0 = inlined_call_operand.vmem [shape: bf16[32,48], index: 0, kind: input, shape index: {}]   ;;  %s347_s2 = inlined_call_operand.vmem [shape: f32[1,256], index: 2, kind: input, shape index: {}]   ;;  %s348_s3 = inlined_call_operand.vmem [shape: bf16[32,256], index: 3, kind: output, shape index: {}]  }
   0x1   :  { %v254_v0 = vld [vmem:[%s345_s1 + $0x4] ss:$8 sps:$4 sm:$0xff]   ;;  %116 = vmatprep.mubr.bf16.mxu0 %v273_v1  ;;  %126 = vmatprep.mubr.bf16.mxu1 %v273_v1  ;;  %v256_v2 = vld [vmem:[%s345_s1] ss:$8 sps:$4 sm:$0xff]   ;;  %v257_v3 = vld [vmem:[%s345_s1 + $0x14] ss:$8 sps:$4 sm:$0xff]  }
   0x2   :  { %84 = vmatprep.subr.bf16.mxu0 %v254_v0  ;;  %247 = vmatprep.subr.bf16.mxu1 %v254_v0  ;;  %v259_v4 = vld [vmem:[%s345_s1 + $0x10] ss:$8 sps:$4 sm:$0xff]   ;;  %v260_v5 = vld [vmem:[%s345_s1 + $0x24] ss:$8 sps:$4 sm:$0xff]   ;;  %v262_v6 = vld [vmem:[%s345_s1 + $0x20] ss:$8 sps:$4 sm:$0xff]  }
   0x3   :  { %85 = vmatpush1.bf16.msra.mxu0 %v256_v2  ;;  %250 = vmatpush1.bf16.msra.mxu1 %v256_v2  ;;  %v263_v7 = vld [vmem:[%s346_s0] sm:$0xff]   ;;  %v264_v8 = vld [vmem:[%s346_s0 + $0x8] sm:$0xff]   ;;  %v28_v10 = vshrl.u32 %v27_v9, 7 }
   0x4   :  { %86 = vmatprep.subr.bf16.mxu0 %v257_v3  ;;  %248 = vmatprep.subr.bf16.mxu1 %v257_v3  ;;  %v25_v12 = vld [vmem:[%s347_s2] sm:$0x3] }
   0x5   :  { %v29_v11 = vsub.s32 0, %v28_v10  ;;  %v33_v13 = vsub.s32 1, %v28_v10 }
   0x7   :  { %87 = vmatpush1.bf16.msra.mxu0 %v259_v4  ;;  %251 = vmatpush1.bf16.msra.mxu1 %v259_v4  ;;  %v30_v14 = vrot.slane %v25_v12, %v29_v11  ;;  %v34_v15 = vrot.slane %v25_v12, %v33_v13 }
   0x8   :  { %88 = vmatprep.subr.bf16.mxu0 %v260_v5  ;;  %249 = vmatprep.subr.bf16.mxu1 %v260_v5 }
   0xb   :  { %89 = vmatpush1.bf16.msra.mxu0 %v262_v6  ;;  %252 = vmatpush1.bf16.msra.mxu1 %v262_v6 }
   0xe   :  { %229 = vmatmul.mubr.msk.bf16.vlgmr.msra.gmra.mrb[0].mxu0 %vm77_vm0, %v263_v7  ;;  %230 = vmatmul.mubr.msk.bf16.vlgmr.msra.gmra.mrb[0].mxu1 %vm77_vm0, %v264_v8 }
  0xe1   :  { %v118_v16 = vpop.f32.mrb[0].mxu0  ;;  %v128_v17 = vpop.f32.mrb[0].mxu1 }
  0xe2   :  { %v119_v18 = vadd.f32 %v118_v16, %v30_v14  ;;  %v129_v19 = vadd.f32 %v128_v17, %v30_v14  ;;  %v120_v20 = vpop.f32.mrb[1].mxu0  ;;  %v130_v21 = vpop.f32.mrb[1].mxu1 }
  0xe3   :  { %v121_v22 = vadd.f32 %v120_v20, %v34_v15  ;;  %v131_v23 = vadd.f32 %v130_v21, %v34_v15  ;;  %v122_v24 = vpop.f32.mrb[2].mxu0  ;;  %v132_v25 = vpop.f32.mrb[2].mxu1 }
  0xe4   :  { %v137_v26 = vmax.f32 %v119_v18, 0.0  ;;  %v139_v27 = vmax.f32 %v129_v19, 0.0  ;;  %v123_v28 = vadd.f32 %v122_v24, %v30_v14  ;;  %v133_v29 = vadd.f32 %v132_v25, %v30_v14  ;;  %v124_v30 = vpop.f32.mrb[3].mxu0  ;;  %v134_v31 = vpop.f32.mrb[3].mxu1 }
  0xe5   :  { %v141_v32 = vmul.f32 %v121_v22, %v121_v22  ;;  %v143_v33 = vmul.f32 %v131_v23, %v131_v23  ;;  %v125_v34 = vadd.f32 %v124_v30, %v34_v15  ;;  %v135_v35 = vadd.f32 %v134_v31, %v34_v15 }
  0xe6   :  { %v239_v36 = vpack.c.bf16 %v137_v26, %v137_v26  ;;  %v241_v37 = vpack.c.bf16 %v139_v27, %v139_v27  ;;  %v138_v38 = vmax.f32 %v123_v28, 0.0  ;;  %v140_v39 = vmax.f32 %v133_v29, 0.0 }
  0xe7   :  { %v145_v40 = vmul.f32 %v141_v32, %v121_v22  ;;  %v147_v41 = vmul.f32 %v143_v33, %v131_v23  ;;  %v142_v42 = vmul.f32 %v125_v34, %v125_v34  ;;  %v144_v43 = vmul.f32 %v135_v35, %v135_v35 }
  0xe8   :  { %193 = vst [vmem:[%s348_s3] sm:$0xf] %v239_v36  ;;  %195 = vst [vmem:[%s348_s3 + $0x10] sm:$0xf] %v241_v37  ;;  %v240_v44 = vpack.c.bf16 %v138_v38, %v138_v38  ;;  %v242_v45 = vpack.c.bf16 %v140_v39, %v140_v39 }
  0xe9   :  { %v149_v46 = vmul.f32 0.044715, %v145_v40  ;;  %v151_v47 = vmul.f32 0.044715, %v147_v41  ;;  %v146_v48 = vmul.f32 %v142_v42, %v125_v34  ;;  %v148_v49 = vmul.f32 %v144_v43, %v135_v35 }
  0xea   :  { %194 = vst [vmem:[%s348_s3 + $0x8] sm:$0xf] %v240_v44  ;;  %196 = vst [vmem:[%s348_s3 + $0x18] sm:$0xf] %v242_v45 }
  0xeb   :  { %v153_v50 = vadd.f32 %v149_v46, %v121_v22  ;;  %v155_v51 = vadd.f32 %v151_v47, %v131_v23  ;;  %v150_v52 = vmul.f32 0.044715, %v146_v48  ;;  %v152_v53 = vmul.f32 0.044715, %v148_v49 }
  0xed   :  { %v157_v54 = vmul.f32 0.7978846, %v153_v50  ;;  %v159_v55 = vmul.f32 0.7978846, %v155_v51  ;;  %v154_v56 = vadd.f32 %v150_v52, %v125_v34  ;;  %v156_v57 = vadd.f32 %v152_v53, %v135_v35 }
  0xef   :  { %265 = vtanh.f32 %v157_v54  ;;  %v158_v58 = vmul.f32 0.7978846, %v154_v56  ;;  %v160_v59 = vmul.f32 0.7978846, %v156_v57 }
  0xf0   :  { %267 = vtanh.f32 %v159_v55 }
  0xf1   :  { %269 = vtanh.f32 %v158_v58 }
  0xf2   :  { %271 = vtanh.f32 %v160_v59 }
  0xf9   :  { %v266_v60 = vpop.eup %265 }
  0xfa   :  { %v268_v61 = vpop.eup %267  ;;  %v165_v62 = vadd.f32 1.0, %v266_v60 }
  0xfb   :  { %v270_v63 = vpop.eup %269  ;;  %v167_v0 = vadd.f32 1.0, %v268_v61 }
  0xfc   :  { %v272_v1 = vpop.eup %271  ;;  %v169_v2 = vmul.f32 0.5, %v165_v62  ;;  %v166_v3 = vadd.f32 1.0, %v270_v63 }
  0xfd   :  { %v171_v4 = vmul.f32 0.5, %v167_v0  ;;  %v168_v5 = vadd.f32 1.0, %v272_v1 }
  0xfe   :  { %v173_v6 = vmul.f32 %v169_v2, %v121_v22  ;;  %v170_v7 = vmul.f32 0.5, %v166_v3 }
  0xff   :  { %v175_v8 = vmul.f32 %v171_v4, %v131_v23  ;;  %v172_v9 = vmul.f32 0.5, %v168_v5 }
 0x100   :  { %v243_v10 = vpack.c.bf16 %v173_v6, %v173_v6  ;;  %v174_v11 = vmul.f32 %v170_v7, %v125_v34 }
 0x101   :  { %v245_v12 = vpack.c.bf16 %v175_v8, %v175_v8  ;;  %v176_v13 = vmul.f32 %v172_v9, %v135_v35 }
 0x102   :  { %213 = vst [vmem:[%s348_s3 + $0x4] sm:$0xf] %v243_v10  ;;  %v244_v14 = vpack.c.bf16 %v174_v11, %v174_v11 }
 0x103   :  { %215 = vst [vmem:[%s348_s3 + $0x14] sm:$0xf] %v245_v12  ;;  %v246_v15 = vpack.c.bf16 %v176_v13, %v176_v13 }
 0x104   :  { %214 = vst [vmem:[%s348_s3 + $0xc] sm:$0xf] %v244_v14 }
 0x105   :  { %216 = vst [vmem:[%s348_s3 + $0x1c] sm:$0xf] %v246_v15 }

// kernel: _forward_impl.7
= control target key start
LH: loop header
LB: loop body
LE: loop exit
PB: predicated region body
PF: predicated region fallthrough
CT: control target
= control target key end

     0   :  { %9 = vsyncpa [#allocation4], 0  ;;  %s1081_s0 = inlined_call_operand.vmem [shape: bf16[2,2,2,256], index: 0, kind: input, shape index: {}]   ;;  %s1082_s1 = inlined_call_operand.vmem [shape: f32[16,2], index: 1, kind: input, shape index: {}]   ;;  %s1083_s2 = inlined_call_operand.vmem [shape: f32[2,16], index: 2, kind: input, shape index: {}]   ;;  %s1084_s3 = inlined_call_operand.hbm [shape: f32[2,16,16], index: 3, kind: input, shape index: {}, may-alias: {3,4}]   ;;  %s1085_s4 = inlined_call_operand.hbm [shape: f32[2,16,16], index: 4, kind: output, shape index: {}, may-alias: {3,4}]  }
   0x1   :  { %11 = vsyncpa [#allocation4 + $0x1], 0 }
   0x2   :  { %12 = vsyncpa [#allocation5], 0 }
   0x3   :  { %14 = vsyncpa [#allocation5 + $0x1], 0  ;;  %s877_s15 = smov 0   ;;  %s879_s16 = smov 0  }
   0x4   :  { %s881_s17 = smov 0   ;;  %s883_s18 = smov 0  }
   0x5 LB: > { %s898_s19 = sadd.s32 4294967295, %s842_s18   ;;  %s643_s20 = sadd.s32 4294967294, %s842_s18   ;;  %s842_s18 = sphi %s883_s18, %s1098_s18   ;;  %s838_s17 = sphi %s881_s17, %s1097_s17   ;;  %s834_s16 = sphi %s879_s16, %s1096_s16   ;;  %s830_s15 = sphi %s877_s15, %s1095_s15  }
   0x6   : > { %s902_s21 = sadd.s32 1, %s842_s18   ;;  %s95_s22 = sadd.s32 1, %s838_s17 }
   0x7   : > { %s92_s23 = ssub.s32 %s842_s18, %s902_s21  ;;  %p102_p0 = scmp.ne.s32.totalorder %s838_s17, %s834_s16 }
   0x8   : > { %p93_p1 = scmp.eq.s32.totalorder %s92_s23, 0  ;;  %p103_p2 = scmp.eq.s32.totalorder %s842_s18, 0 }
   0x9   : > { %p108_p3 = scmp.ne.s32.totalorder %s834_s16, %s830_s15  ;;  %p109_p4 = scmp.eq.s32.totalorder %s898_s19, 0 }
   0xa   : > { %s914_s24 = scalar_select %p93_p1, %s838_s17, %s95_s22  }
   0xb   : > { %p916_p5 = por %p103_p2, %p102_p0  ;;  %p920_p6 = por %p109_p4, %p108_p3 }
   0xc   : > { %p132_p7 = scmp.eq.s32.totalorder %s898_s19, 1  ;;  %p138_p8 = scmp.eq.s32.totalorder %s643_s20, 1 }
   0xd   : > { %p698_p10 = scmp.lt.s32.totalorder %s842_s18, 2  ;;  %s171_s29 = sand.u32 1, %s838_s17  }
   0xe   : > { %p927_p11 = por %p132_p7, %p102_p0  ;;  %p931_p12 = por %p138_p8, %p108_p3 }
   0xf   : > { %s668_s30 = sshll.u32 %s842_s18, 8  ;;  %s646_s5 = sshll.u32 %s171_s29, 4 }
  0x10   : > { %s1089_s27 = scalar_select %p927_p11, 1, 0 }
  0x11   : > { %s1090_s28 = scalar_select %p931_p12, 1, 0 }
  0x12   : > { %s940_s8 = scalar_lea.hbm %s1084_s3, %s668_s30  ;;  %s175_s9 = scalar_lea.vmem [#allocation3], %s646_s5 }
  0x13   : > { %s182_s10 = sshll.u32 %s175_s9, 4  ;;  %p944_p13 = pnand %p698_p10, %p916_p5  ;;  %s948_s10 = int_to_ptr.vmem [resolvable:$true] %s182_s10 }
  0x14   : > { %s950_s12 = scalar_lea.sflag [#allocation4], %s171_s29  ;;  %s746_s13 = scalar_lea.hbm %s940_s8, 256 }
  0x15   : > { %p747_p0 = scmp.ne.s32.totalorder %s940_s8, %s746_s13  ;;  %p748_p1 = pneg %p944_p13 }
  0x16   : > { %s751_s22 = scalar_lea.hbm %s1084_s3, 512  ;;  %p752_p4 = scmp.lt.u32.totalorder %s940_s8, %s1084_s3 }
  0x17   : > { %p749_p2 = pnand %p748_p1, %p747_p0  ;;  %p753_p5 = scmp.lt.u32.totalorder %s751_s22, %s746_s13 }
  0x18   : > { %p755_p8 = scmp.lt.u32.totalorder %s746_s13, %s940_s8 }
  0x19   : > { %p750_p3 = pneg %p749_p2  ;;  %p754_p7 = por %p753_p5, %p752_p4 }
  0x1b   : > { %p756_p10 = por %p755_p8, %p754_p7 }
  0x1d   : > { %p757_p9 = pnand %p756_p10, %p750_p3 }
  0x1f   : > { %760 = shalt.err (!%p757_p9)
}
  0x20   : > { %s761_s29 = scalar_lea.vmem %s948_s10, 256  ;;  %s844_s30 = smov [#allocation3]  }
  0x21   : > { %p762_p0 = scmp.ne.s32.totalorder %s948_s10, %s761_s29  ;;  %s766_s5 = sshll.u32 %s844_s30, 4  ;;  %s767_s5 = int_to_ptr.vmem [resolvable:$false] %s766_s5 }
  0x22   : > { %s768_s6 = scalar_lea.vmem %s767_s5, 512  ;;  %p769_p11 = scmp.lt.s32.totalorder %s948_s10, %s767_s5 }
  0x23   : > { %p764_p2 = pnand %p762_p0, %p748_p1  ;;  %p770_p4 = scmp.lt.s32.totalorder %s768_s6, %s761_s29 }
  0x25   : > { %p765_p12 = pneg %p764_p2  ;;  %p771_p5 = por %p770_p4, %p769_p11 }
  0x27   : > { %p772_p7 = pnand %p771_p5, %p765_p12 }
  0x29   : > { %775 = shalt.err (!%p772_p7)
}
  0x2a   : > { %s845_s7 = smov 128   ;;  %s846_s9 = smov 8  }
  0x2b   : > { %693 = dma.hbm_to_vmem [thread:$0]  (!%p944_p13), %s940_s8, 256, %s948_s10, %s950_s12, %s845_s7, %s845_s7, %s846_s9  }
  0x2c   : > { %p649_p9 = scmp.ge.s32.totalorder %s842_s18, 1  ;;  %p190_p1 = scmp.lt.s32.totalorder %s842_s18, 3 }
  0x2e   : > { %p191_p3 = pnand %p649_p9, %p190_p1 }
  0x2f   : > { %s981_s13 = sand.u32 (!%p191_p3), 1, %s834_s16  }
  0x30   : > { %194 = sbr.rel (%p191_p3) target bundleno = 715 (0x2cb), region = 36  ;;  %s650_s14 = sshll.u32 (!%p191_p3), %s981_s13, 4 }
  0x31   : > { %s197_s20 = scalar_lea.sflag (!%p191_p3), [#allocation4], %s981_s13  ;;  %s987_s22 = scalar_lea.vmem (!%p191_p3), [#allocation3], %s650_s14 }
  0x37   : > { %821 = dma.done.wait (%p920_p6), %s197_s20, 256  }
  0x38   : > { %823 = vsyncadd (%p920_p6), %s197_s20, 4294967040  ;;  %p229_p11 = scmp.lt.s32.totalorder %s898_s19, 1  ;;  %v246_v0 = vlaneseq  ;;  %v847_v1 = vmov 0.0   ;;  %v848_v2 = vmov 1983009808   ;;  %vm313_vm0 = vcmask 1041408  }
  0x39   : > { %238 = vst [vmem:[#allocation2 + $0x8] sm:$0xff] %v847_v1  ;;  %239 = vst [vmem:[#allocation2 + $0x10] sm:$0xff] %v847_v1  ;;  %v244_v3 = vunpack.c.l.s4 %v848_v2  ;;  %v350_v48 = vld [vmem:[%s1082_s1] sm:$0xff]  ;;  %vm366_vm1 = vcmask 15360   ;;  %vm364_vm2 = vcmask 1041409   ;;  %s669_s7 = sshll.u32 %s898_s19, 8 }
  0x3a   : > { %s230_s8 = scalar_select %p229_p11, %s898_s19, 1  ;;  %v996_v4 = vshrl.u32 %v246_v0, 7  ;;  %678 = vmatprep.mubr.msk.f32.mxu0 %vm366_vm1, %v350_v48  ;;  %v355_v63 = vand.u32 127, %v246_v0  ;;  %v450_v0 = vld [vmem:[%s1083_s2] sm:$0x3]  ;;  %vm541_vm3 = vcmask 130048  }
  0x3b   : > { %v245_v5 = vunpack.c.0.s8 %v244_v3  ;;  %681 = vmatprep.subr.msk.mxu1 %vm313_vm0, %v450_v0  ;;  %s228_s9 = scalar_lea.vmem [#allocation6], %s650_s14  ;;  %s1035_s11 = scalar_lea.hbm %s1085_s4, %s669_s7 }
  0x3c   : > { %s652_s10 = sshll.u32 %s230_s8, 2  ;;  %682 = vmatpush3.msk.msra.mxu1 %vm313_vm0, %v450_v0  ;;  %s558_s20 = sshll.u32 %s228_s9, 4  ;;  %s1037_s20 = int_to_ptr.vmem [resolvable:$true] %s558_s20 }
  0x3d   : > { %s232_s26 = scalar_lea.vmem %s1081_s0, %s652_s10  ;;  %v248_v6 = vsub.s32 %v245_v5, %v996_v4  ;;  %s545_s19 = scalar_lea.sflag [#allocation5], %s981_s13 }
  0x3e   : > { %v233_v7 = vld [vmem:[%s232_s26] sm:$0x3]  ;;  %v234_v8 = vld [vmem:[%s232_s26 + $0x2] sm:$0x3]  ;;  %s776_s14 = scalar_lea.vmem %s1037_s20, 256  ;;  %p1092_p12 = scmp.ne.s32.totalorder %s1089_s27, 0 }
  0x3f   : > { %v235_v9 = vunpack.c.l.bf16 %v233_v7  ;;  %v236_v10 = vunpack.c.l.bf16 %v234_v8  ;;  %v358_v7 = vsub.s32 %v355_v63, %v996_v4  ;;  %p777_p6 = scmp.ne.s32.totalorder %s1037_s20, %s776_s14 }
  0x41   : > { %v249_v11 = vrot.slane %v235_v9, %v248_v6  ;;  %v256_v12 = vrot.slane %v236_v10, %v248_v6  ;;  %p778_p13 = pnand %p777_p6, %p1092_p12 }
  0x43   : > { %v257_v13 = vrot.slane %v249_v11, 7  ;;  %v258_v14 = vrot.slane %v256_v12, 7  ;;  %v351_v12 = vld [vmem:[%s1082_s1 + $0x8] sm:$0xff]  ;;  %p779_p8 = pneg %p778_p13 }
  0x45   : > { %262 = vst [vmem:[#allocation2 + $0x8] sm:$0x66] %v257_v13  ;;  %263 = vst [vmem:[#allocation2 + $0x10] sm:$0x66] %v258_v14 }
  0x4c   : > { %v266_v15 = vld [vmem:[#allocation2 + $0x8] sm:$0xff]  ;;  %v271_v16 = vld [vmem:[#allocation2 + $0x10] sm:$0xff] }
  0x4d   : > { %v269_v17 = vadd.f32 %v271_v16, %v266_v15  ;;  %v536_v15 = vld [vmem:[%s987_s22 + $0x8] sm:$0xff] }
  0x4f   : > { %275 = vst [vmem:[#allocation2] sm:$0xff] %v269_v17  ;;  %276 = vst [vmem:[#allocation2 + $0x8] sm:$0xff] %v269_v17 }
  0x56   : > { %v277_v18 = vld [vmem:[#allocation2] sm:$0x33]  ;;  %v291_v20 = vld [vmem:[#allocation2] sm:$0xcc]  ;;  %v278_v23 = vld [vmem:[#allocation2 + $0x8] sm:$0x33] }
  0x57   : > { %v279_v19 = vld [vmem:[#allocation2] sm:$0x66]  ;;  %v655_v22 = vrot.slane %v291_v20, 10  ;;  %v280_v24 = vld [vmem:[#allocation2 + $0x8] sm:$0x66] }
  0x58   : > { %v653_v21 = vrot.slane %v279_v19, 9  ;;  %v654_v25 = vrot.slane %v280_v24, 9  ;;  %v292_v26 = vld [vmem:[#allocation2 + $0x8] sm:$0xcc] }
  0x59   : > { %v656_v28 = vrot.slane %v292_v26, 10 }
  0x5a   : > { %v289_v27 = vadd.f32 %v653_v21, %v277_v18  ;;  %v290_v29 = vadd.f32 %v654_v25, %v278_v23  ;;  %v535_v18 = vld [vmem:[%s987_s22] sm:$0xff]  ;;  %s849_s22 = smov [#allocation6]  }
  0x5b   : > { %s780_s12 = sshll.u32 %s849_s22, 4  ;;  %s781_s12 = int_to_ptr.vmem [resolvable:$false] %s780_s12 }
  0x5c   : > { %v301_v30 = vadd.f32 %v655_v22, %v289_v27  ;;  %v302_v31 = vadd.f32 %v656_v28, %v290_v29  ;;  %s782_s26 = scalar_lea.vmem %s781_s12, 512  ;;  %p783_p10 = scmp.lt.s32.totalorder %s1037_s20, %s781_s12 }
  0x5d   : > { %p784_p0 = scmp.lt.s32.totalorder %s782_s26, %s776_s14 }
  0x5e   : > { %v303_v32 = vmul.f32 0.11111111, %v301_v30  ;;  %v304_v33 = vmul.f32 0.11111111, %v302_v31 }
  0x5f   : > { %p785_p2 = por %p784_p0, %p783_p10 }
  0x60   : > { %v320_v34 = vmul.f32 %v303_v32, %v303_v32  ;;  %v307_v35 = vrot.slane %v303_v32, 4  ;;  %v321_v36 = vmul.f32 %v304_v33, %v304_v33  ;;  %v308_v37 = vrot.slane %v304_v33, 4 }
  0x61   : > { %p786_p4 = pnand %p785_p2, %p779_p8 }
  0x62   : > { %v322_v38 = vsel %vm313_vm0, %v320_v34, 0.0  ;;  %v328_v39 = vmul.f32 %v307_v35, %v307_v35  ;;  %v329_v40 = vmul.f32 %v308_v37, %v308_v37  ;;  %v325_v42 = vsel %vm313_vm0, %v321_v36, 0.0 }
  0x63   : > { %323 = vadd.xlane.f32.xlu0 %v322_v38  ;;  %v311_v43 = vmul.f32 %v307_v35, %v303_v32  ;;  %v312_v45 = vmul.f32 %v308_v37, %v304_v33 }
  0x64   : > { %v330_v41 = vsel %vm313_vm0, %v328_v39, 0.0  ;;  %v333_v44 = vsel %vm313_vm0, %v329_v40, 0.0 }
  0x65   : > { %331 = vadd.xlane.f32.xlu1 %v330_v41  ;;  %v314_v46 = vsel %vm313_vm0, %v311_v43, 0.0  ;;  %v317_v47 = vsel %vm313_vm0, %v312_v45, 0.0 }
  0x67   : > { %326 = vadd.xlane.f32.xlu0 %v325_v42 }
  0x69   : > { %334 = vadd.xlane.f32.xlu1 %v333_v44 }
  0x6b   : > { %315 = vadd.xlane.f32.xlu0 %v314_v46 }
  0x6d   : > { %318 = vadd.xlane.f32.xlu1 %v317_v47 }
  0xf0   : > { %v324_v49 = vpop.xlane.xlu0 %323 }
  0xf1   : > { %v336_v50 = vmax.f32 %v324_v49, 1e-16 }
  0xf2   : > { %v332_v51 = vpop.xlane.xlu1 %331 }
  0xf3   : > { %738 = vrsqrt.f32 %v336_v50  ;;  %v342_v52 = vmax.f32 %v332_v51, 1e-16 }
  0xf4   : > { %v327_v53 = vpop.xlane.xlu0 %326 }
  0xf5   : > { %740 = vrsqrt.f32 %v342_v52  ;;  %v337_v54 = vmax.f32 %v327_v53, 1e-16 }
  0xf6   : > { %v335_v55 = vpop.xlane.xlu1 %334 }
  0xf7   : > { %742 = vrsqrt.f32 %v337_v54  ;;  %v343_v56 = vmax.f32 %v335_v55, 1e-16 }
  0xf8   : > { %v316_v57 = vpop.xlane.xlu0 %315 }
  0xf9   : > { %744 = vrsqrt.f32 %v343_v56 }
  0xfa   : > { %v319_v61 = vpop.xlane.xlu1 %318 }
  0xfd   : > { %v739_v58 = vpop.eup %738 }
  0xfe   : > { %v340_v59 = vmul.f32 %v739_v58, %v316_v57 }
  0xff   : > { %v741_v60 = vpop.eup %740 }
 0x100   : > { %v346_v62 = vmul.f32 %v741_v60, %v340_v59 }
 0x101   : > { %v743_v1 = vpop.eup %742 }
 0x102   : > { %v341_v2 = vmul.f32 %v743_v1, %v319_v61  ;;  %v348_v5 = vsub.f32 1.0, %v346_v62 }
 0x103   : > { %v745_v3 = vpop.eup %744 }
 0x104   : > { %v347_v6 = vmul.f32 %v745_v3, %v341_v2  ;;  %v359_v9 = vrot.slane %v348_v5, %v358_v7 }
 0x106   : > { %v349_v8 = vsub.f32 1.0, %v347_v6 }
 0x108   : > { %v363_v10 = vrot.slane %v349_v8, %v358_v7 }
 0x10a   : > { %v365_v11 = vsel %vm364_vm2, %v363_v10, %v359_v9 }
 0x10b   : > { %676 = vmatprep.subr.msk.mxu0 %vm313_vm0, %v365_v11 }
 0x10c   : > { %677 = vmatpush3.msk.msra.mxu0 %vm313_vm0, %v365_v11 }
 0x10d   : > { %679 = vmatmul.mubr.msk.f32.vlgmr.msra.gmra.mrb[0].mxu0 %vm366_vm1, %v351_v12 }
 0x1e0   : > { %v680_v4 = vpop.f32.mrb[0].mxu0 }
 0x1e1   : > { %v441_v13 = vpop.f32.mrb[1].mxu0 }
 0x1e2   : > { %683 = vmatprep.mubr.msk.f32.mxu1 %vm366_vm1, %v441_v13 }
 0x1e3   : > { %684 = vmatmul.mubr.msk.f32.vlgmr.msra.gmra.mrb[0].mxu1 %vm366_vm1, %v680_v4 }
 0x2b6   : > { %v685_v14 = vpop.f32.mrb[0].mxu1 }
 0x2b7   : > { %v538_v16 = vmul.f32 0.5, %v685_v14  ;;  %v526_v17 = vpop.f32.mrb[1].mxu1 }
 0x2b8   : > { %v537_v19 = vmul.f32 0.5, %v526_v17 }
 0x2b9   : > { %v540_v20 = vadd.f32 %v538_v16, %v536_v15 }
 0x2ba   : > { %v539_v21 = vadd.f32 %v537_v19, %v535_v18 }
 0x2bb   : > { %543 = vst.msk [vmem:[%s228_s9 + $0x8] sm:$0xff] %vm541_vm3, %v540_v20 }
 0x2bc   : > { %542 = vst.msk [vmem:[%s228_s9] sm:$0xff] %vm541_vm3, %v539_v21 }
 0x2bd   : > { %789 = shalt.err (!%p786_p4)
}
 0x2be   : > { %s790_s23 = scalar_lea.hbm %s1035_s11, 256  ;;  %s794_s30 = scalar_lea.hbm %s1085_s4, 512 }
 0x2bf   : > { %p791_p5 = scmp.ne.s32.totalorder %s1035_s11, %s790_s23  ;;  %p795_p1 = scmp.lt.u32.totalorder %s1035_s11, %s1085_s4 }
 0x2c0   : > { %p796_p3 = scmp.lt.u32.totalorder %s794_s30, %s790_s23  ;;  %p798_p6 = scmp.lt.u32.totalorder %s790_s23, %s1035_s11 }
 0x2c1   : > { %p792_p7 = pnand %p791_p5, %p1092_p12 }
 0x2c2   : > { %p797_p11 = por %p796_p3, %p795_p1 }
 0x2c3   : > { %p793_p9 = pneg %p792_p7 }
 0x2c4   : > { %p799_p13 = por %p798_p6, %p797_p11 }
 0x2c6   : > { %p800_p8 = pnand %p799_p13, %p793_p9 }
 0x2c8   : > { %803 = shalt.err (!%p800_p8)
}
 0x2c9   : > { %s850_s7 = smov 128   ;;  %s851_s9 = smov 8  }
 0x2ca   : > { %688 = dma.vmem_to_hbm [thread:$0]  (%p1092_p12), %s1037_s20, 256, %s1035_s11, %s545_s19, %s850_s7, %s850_s7, %s851_s9  }
 0x2cb PF: > { %s573_s8 = sand.u32 1, %s830_s15   ;;  %p1093_p10 = scmp.ne.s32.totalorder %s1090_s28, 0 }
 0x2cc   : > { %p1094_p0 = scmp.ge.s32.totalorder %s842_s18, 2  ;;  %s574_s10 = scalar_lea.sflag [#allocation5], %s573_s8 }
 0x2ce   : > { %p695_p2 = pnand %p1094_p0, %p1093_p10 }
 0x2d0   : > { %825 = dma.done.wait (!%p695_p2), %s574_s10, 256  }
 0x2d1   : > { %827 = vsyncadd (!%p695_p2), %s574_s10, 4294967040  ;;  %p17_p4 = scmp.ge.s32.totalorder %s902_s21, 4   ;;  %s1095_s15 = smov %s834_s16 }
 0x2d2   : > { %s1096_s16 = smov %s838_s17  ;;  %s1097_s17 = smov %s914_s24 }
 0x2d3   : > { %s1098_s18 = smov %s902_s21  ;;  %19 = sbr.rel (!%p17_p4) target bundleno = 5 (0x5), region = 86 }
 0x2da   :  { %579 = vsyncpa [#allocation4], 1 }
 0x2db   :  { %581 = vsyncpa [#allocation4 + $0x1], 1 }
 0x2dc   :  { %582 = vsyncpa [#allocation5], 1 }
 0x2dd   :  { %584 = vsyncpa [#allocation5 + $0x1], 1 }

// kernel: _forward_impl.5
= control target key start
LH: loop header
LB: loop body
LE: loop exit
PB: predicated region body
PF: predicated region fallthrough
CT: control target
= control target key end

     0   :  { %s874_s15 = smov 0   ;;  %s939_s0 = inlined_call_operand.vmem [shape: bf16[2,4,4,256], index: 0, kind: input, shape index: {}]   ;;  %s940_s1 = inlined_call_operand.vmem [shape: f32[16,4], index: 1, kind: input, shape index: {}]   ;;  %s941_s2 = inlined_call_operand.vmem [shape: f32[4,16], index: 2, kind: input, shape index: {}]   ;;  %s942_s3 = inlined_call_operand.vmem [shape: f32[2,16,16], index: 3, kind: input, shape index: {}, may-alias: {3,4}]   ;;  %s943_s4 = inlined_call_operand.vmem [shape: f32[2,16,16], index: 4, kind: output, shape index: {}, may-alias: {3,4}]  }
   0x1 LB: > { %s768_s16 = sadd.s32 4294967295, %s846_s15   ;;  %p772_p0 = scmp.ge.s32.totalorder %s846_s15, 1  ;;  %s846_s15 = sphi %s874_s15, %s14_s15  }
   0x2   : > { %p172_p1 = scmp.lt.s32.totalorder %s846_s15, 3 }
   0x4   : > { %p173_p2 = pnand %p772_p0, %p172_p1 }
   0x5   : > { %p882_p3 = scmp.lt.s32.totalorder (!%p173_p2), %s768_s16, 1  ;;  %v848_v0 = vmov (!%p173_p2), 0.0   ;;  %vm420_vm0 = vcmask (!%p173_p2), 1043456   ;;  %vm523_vm1 = vcmask (!%p173_p2), 31744   ;;  %vm517_vm2 = vcmask (!%p173_p2), 1041409  }
   0x6   : > { %176 = sbr.rel (%p173_p2) target bundleno = 666 (0x29a), region = 36  ;;  %228 = vst [vmem:[#allocation2 + $0x10] sm:$0x3f] (!%p173_p2), %v848_v0  ;;  %229 = vst [vmem:[#allocation2 + $0x18] sm:$0x3f] (!%p173_p2), %v848_v0  ;;  %vm519_vm3 = vcmask (!%p173_p2), 1042434  }
   0x7   : > { %230 = vst [vmem:[#allocation2 + $0x20] sm:$0x3f] (!%p173_p2), %v848_v0  ;;  %231 = vst [vmem:[#allocation2 + $0x28] sm:$0x3f] (!%p173_p2), %v848_v0  ;;  %vm521_vm4 = vcmask (!%p173_p2), 1043459   ;;  %vm698_vm5 = vcmask (!%p173_p2), 130048  }
   0x8   : > { %232 = vst [vmem:[#allocation2 + $0x30] sm:$0x3f] (!%p173_p2), %v848_v0  ;;  %233 = vst [vmem:[#allocation2 + $0x38] sm:$0x3f] (!%p173_p2), %v848_v0 }
   0x9   : > { %234 = vst [vmem:[#allocation2 + $0x40] sm:$0x3f] (!%p173_p2), %v848_v0  ;;  %235 = vst [vmem:[#allocation2 + $0x48] sm:$0x3f] (!%p173_p2), %v848_v0 }
   0xa   : > { %226 = vst [vmem:[#allocation2] sm:$0x3f] (!%p173_p2), %v848_v0  ;;  %227 = vst [vmem:[#allocation2 + $0x8] sm:$0x3f] (!%p173_p2), %v848_v0 }
   0xb   : > { %236 = vst [vmem:[#allocation2 + $0x50] sm:$0x3f] (!%p173_p2), %v848_v0  ;;  %237 = vst [vmem:[#allocation2 + $0x58] sm:$0x3f] (!%p173_p2), %v848_v0 }
   0xd   : > { %s946_s16 = smov (!%p882_p3, %s768_s16), 1 }
   0xe   : > { %s888_s18 = sshll.u32 %s946_s16, 4 }
   0xf   : > { %s207_s21 = scalar_lea.vmem %s939_s0, %s888_s18  ;;  %s212_s30 = scalar_lea.vmem %s942_s3, %s888_s18 }
  0x10   : > { %v791_v1 = vld [vmem:[%s207_s21] sm:$0xff]   ;;  %v798_v2 = vld [vmem:[%s207_s21 + $0x8] sm:$0xff]   ;;  %s217_s7 = scalar_lea.vmem %s943_s4, %s888_s18 }
  0x11   : > { %v793_v3 = vunpack.c.h.bf16 %v791_v1  ;;  %v796_v4 = vunpack.c.l.bf16 %v798_v2  ;;  %v797_v5 = vunpack.c.h.bf16 %v798_v2  ;;  %v792_v6 = vunpack.c.l.bf16 %v791_v1  ;;  %v271_v19 = vld [vmem:[#allocation2] sm:$0x3f]  ;;  %v272_v20 = vld [vmem:[#allocation2 + $0x8] sm:$0x3f] }
  0x12   : > { %v302_v24 = vld [vmem:[#allocation2 + $0x50] sm:$0x3f]  ;;  %v303_v54 = vld [vmem:[#allocation2 + $0x58] sm:$0x3f] }
  0x13   : > { %v244_v7 = vcombine.high %v796_v4, %v796_v4  ;;  %v245_v8 = vcombine.high %v797_v5, %v797_v5  ;;  %v248_v9 = vrot.slane %v793_v3, 7  ;;  %v250_v10 = vrot.slane %v796_v4, 7 }
  0x14   : > { %v252_v11 = vrot.slane %v797_v5, 7  ;;  %v242_v12 = vcombine.high %v792_v6, %v792_v6  ;;  %v243_v13 = vcombine.high %v793_v3, %v793_v3  ;;  %v246_v14 = vrot.slane %v792_v6, 7 }
  0x15   : > { %v251_v15 = vrot.slane %v244_v7, 7  ;;  %v253_v16 = vrot.slane %v245_v8, 7  ;;  %265 = vst [vmem:[#allocation2 + $0x20] sm:$0x1e] %v248_v9  ;;  %267 = vst [vmem:[#allocation2 + $0x30] sm:$0x1e] %v250_v10 }
  0x16   : > { %269 = vst [vmem:[#allocation2 + $0x40] sm:$0x1e] %v252_v11  ;;  %v247_v17 = vrot.slane %v242_v12, 7  ;;  %v249_v18 = vrot.slane %v243_v13, 7  ;;  %263 = vst [vmem:[#allocation2 + $0x10] sm:$0x1e] %v246_v14 }
  0x17   : > { %268 = vst [vmem:[#allocation2 + $0x38] sm:$0x1e] %v251_v15  ;;  %270 = vst [vmem:[#allocation2 + $0x48] sm:$0x1e] %v253_v16 }
  0x18   : > { %264 = vst [vmem:[#allocation2 + $0x18] sm:$0x1e] %v247_v17  ;;  %266 = vst [vmem:[#allocation2 + $0x28] sm:$0x1e] %v249_v18 }
  0x1c   : > { %v275_v21 = vld [vmem:[#allocation2 + $0x20] sm:$0x3f]  ;;  %v283_v23 = vld [vmem:[#allocation2 + $0x30] sm:$0x3f] }
  0x1d   : > { %v281_v22 = vld [vmem:[#allocation2 + $0x20] sm:$0x3f]  ;;  %v291_v25 = vadd.f32 %v283_v23, %v275_v21  ;;  %v279_v28 = vld [vmem:[#allocation2 + $0x10] sm:$0x3f] }
  0x1e   : > { %v296_v26 = vld [vmem:[#allocation2 + $0x20] sm:$0x3f]  ;;  %v287_v29 = vadd.f32 %v279_v28, %v271_v19  ;;  %v277_v30 = vld [vmem:[#allocation2 + $0x30] sm:$0x3f]  ;;  %v299_v43 = vld [vmem:[#allocation2 + $0x38] sm:$0x3f] }
  0x1f   : > { %v300_v27 = vld [vmem:[#allocation2 + $0x40] sm:$0x3f]  ;;  %v298_v32 = vld [vmem:[#allocation2 + $0x30] sm:$0x3f]  ;;  %v280_v36 = vld [vmem:[#allocation2 + $0x18] sm:$0x3f] }
  0x20   : > { %v285_v31 = vld [vmem:[#allocation2 + $0x40] sm:$0x3f]  ;;  %v308_v33 = vadd.f32 %v300_v27, %v291_v25  ;;  %v273_v35 = vld [vmem:[#allocation2 + $0x10] sm:$0x3f]  ;;  %v297_v37 = vld [vmem:[#allocation2 + $0x28] sm:$0x3f]  ;;  %v304_v38 = vadd.f32 %v296_v26, %v287_v29  ;;  %v288_v40 = vadd.f32 %v280_v36, %v272_v20 }
  0x21   : > { %v293_v34 = vadd.f32 %v285_v31, %v277_v30  ;;  %v289_v39 = vadd.f32 %v281_v22, %v273_v35  ;;  %v274_v41 = vld [vmem:[#allocation2 + $0x18] sm:$0x3f]  ;;  %v282_v42 = vld [vmem:[#allocation2 + $0x28] sm:$0x3f] }
  0x22   : > { %316 = vst [vmem:[#allocation2 + $0x20] sm:$0x3f] %v308_v33  ;;  %v290_v45 = vadd.f32 %v282_v42, %v274_v41  ;;  %v276_v46 = vld [vmem:[#allocation2 + $0x28] sm:$0x3f]  ;;  %v284_v47 = vld [vmem:[#allocation2 + $0x38] sm:$0x3f]  ;;  %v305_v50 = vadd.f32 %v297_v37, %v288_v40 }
  0x23   : > { %v310_v44 = vadd.f32 %v302_v24, %v293_v34  ;;  %v301_v48 = vld [vmem:[#allocation2 + $0x48] sm:$0x3f]  ;;  %312 = vst [vmem:[#allocation2] sm:$0x3f] %v304_v38  ;;  %v306_v49 = vadd.f32 %v298_v32, %v289_v39  ;;  %v292_v51 = vadd.f32 %v284_v47, %v276_v46  ;;  %v278_v52 = vld [vmem:[#allocation2 + $0x38] sm:$0x3f] }
  0x24   : > { %v286_v53 = vld [vmem:[#allocation2 + $0x48] sm:$0x3f]  ;;  %v307_v55 = vadd.f32 %v299_v43, %v290_v45  ;;  %313 = vst [vmem:[#allocation2 + $0x8] sm:$0x3f] %v305_v50 }
  0x25   : > { %318 = vst [vmem:[#allocation2 + $0x30] sm:$0x3f] %v310_v44  ;;  %v294_v56 = vadd.f32 %v286_v53, %v278_v52  ;;  %314 = vst [vmem:[#allocation2 + $0x10] sm:$0x3f] %v306_v49  ;;  %v309_v57 = vadd.f32 %v301_v48, %v292_v51 }
  0x26   : > { %315 = vst [vmem:[#allocation2 + $0x18] sm:$0x3f] %v307_v55 }
  0x27   : > { %v311_v58 = vadd.f32 %v303_v54, %v294_v56  ;;  %317 = vst [vmem:[#allocation2 + $0x28] sm:$0x3f] %v309_v57 }
  0x29   : > { %319 = vst [vmem:[#allocation2 + $0x38] sm:$0x3f] %v311_v58  ;;  %v324_v59 = vld [vmem:[#allocation2 + $0x20] sm:$0xf] }
  0x2a   : > { %v332_v60 = vld [vmem:[#allocation2 + $0x20] sm:$0x1e] }
  0x2b   : > { %v372_v61 = vld [vmem:[#allocation2 + $0x20] sm:$0x3c]  ;;  %v348_v62 = vrot.slane %v332_v60, 1  ;;  %v321_v17 = vld [vmem:[#allocation2 + $0x8] sm:$0xf] }
  0x2c   : > { %v388_v63 = vrot.slane %v372_v61, 2  ;;  %v320_v0 = vld [vmem:[#allocation2] sm:$0xf]  ;;  %v326_v4 = vld [vmem:[#allocation2 + $0x30] sm:$0xf] }
  0x2d   : > { %v328_v1 = vld [vmem:[#allocation2] sm:$0x1e]  ;;  %v364_v5 = vadd.f32 %v348_v62, %v324_v59  ;;  %v334_v7 = vld [vmem:[#allocation2 + $0x30] sm:$0x1e]  ;;  %v329_v21 = vld [vmem:[#allocation2 + $0x8] sm:$0x1e] }
  0x2e   : > { %v344_v2 = vrot.slane %v328_v1, 1  ;;  %v368_v3 = vld [vmem:[#allocation2] sm:$0x3c]  ;;  %v374_v8 = vld [vmem:[#allocation2 + $0x30] sm:$0x3c]  ;;  %v350_v10 = vrot.slane %v334_v7, 1 }
  0x2f   : > { %v384_v6 = vrot.slane %v368_v3, 2  ;;  %v390_v11 = vrot.slane %v374_v8, 2  ;;  %v322_v12 = vld [vmem:[#allocation2 + $0x10] sm:$0xf]  ;;  %v404_v14 = vadd.f32 %v388_v63, %v364_v5  ;;  %v369_v22 = vld [vmem:[#allocation2 + $0x8] sm:$0x3c] }
  0x30   : > { %v360_v9 = vadd.f32 %v344_v2, %v320_v0  ;;  %v330_v13 = vld [vmem:[#allocation2 + $0x10] sm:$0x1e]  ;;  %v366_v19 = vadd.f32 %v350_v10, %v326_v4  ;;  %v345_v25 = vrot.slane %v329_v21, 1  ;;  %v385_v26 = vrot.slane %v369_v22, 2  ;;  %v323_v27 = vld [vmem:[#allocation2 + $0x18] sm:$0xf] }
  0x31   : > { %v346_v15 = vrot.slane %v330_v13, 1  ;;  %v370_v16 = vld [vmem:[#allocation2 + $0x10] sm:$0x3c]  ;;  %v894_v23 = vmul.f32 0.11111111, %v404_v14 }
  0x32   : > { %v400_v18 = vadd.f32 %v384_v6, %v360_v9  ;;  %v386_v20 = vrot.slane %v370_v16, 2  ;;  %v406_v29 = vadd.f32 %v390_v11, %v366_v19  ;;  %v331_v30 = vld [vmem:[#allocation2 + $0x18] sm:$0x1e]  ;;  %v361_v34 = vadd.f32 %v345_v25, %v321_v17  ;;  %v325_v36 = vld [vmem:[#allocation2 + $0x28] sm:$0xf]  ;;  %v493_v19 = vld [vmem:[%s940_s1] sm:$0xff] }
  0x33   : > { %v362_v24 = vadd.f32 %v346_v15, %v322_v12  ;;  %v371_v31 = vld [vmem:[#allocation2 + $0x18] sm:$0x3c]  ;;  %v435_v32 = vmul.f32 %v894_v23, %v894_v23  ;;  %v347_v35 = vrot.slane %v331_v30, 1  ;;  %v333_v37 = vld [vmem:[#allocation2 + $0x28] sm:$0x1e]  ;;  %807 = vmatprep.mubr.msk.f32.mxu0 %vm523_vm1, %v493_v19 }
  0x34   : > { %v408_v28 = vmul.f32 0.11111111, %v400_v18  ;;  %v414_v39 = vmul.f32 0.11111111, %v406_v29  ;;  %v387_v40 = vrot.slane %v371_v31, 2  ;;  %v349_v41 = vrot.slane %v333_v37, 1 }
  0x35   : > { %v402_v33 = vadd.f32 %v386_v20, %v362_v24  ;;  %v373_v42 = vld [vmem:[#allocation2 + $0x28] sm:$0x3c]  ;;  %v443_v43 = vsel %vm420_vm0, %v435_v32, 0.0  ;;  %v401_v45 = vadd.f32 %v385_v26, %v361_v34  ;;  %v363_v46 = vadd.f32 %v347_v35, %v323_v27  ;;  %v327_v47 = vld [vmem:[#allocation2 + $0x38] sm:$0xf] }
  0x36   : > { %v433_v38 = vmul.f32 %v408_v28, %v408_v28  ;;  %444 = vadd.xlane.f32.xlu1 %v443_v43  ;;  %v436_v49 = vmul.f32 %v414_v39, %v414_v39  ;;  %v365_v50 = vadd.f32 %v349_v41, %v325_v36  ;;  %v389_v51 = vrot.slane %v373_v42, 2  ;;  %v335_v52 = vld [vmem:[#allocation2 + $0x38] sm:$0x1e] }
  0x37   : > { %v410_v44 = vmul.f32 0.11111111, %v402_v33  ;;  %v375_v53 = vld [vmem:[#allocation2 + $0x38] sm:$0x3c]  ;;  %v409_v55 = vmul.f32 0.11111111, %v401_v45  ;;  %v403_v56 = vadd.f32 %v387_v40, %v363_v46  ;;  %v499_v36 = vlaneseq }
  0x38   : > { %v437_v48 = vsel %vm420_vm0, %v433_v38, 0.0  ;;  %v351_v57 = vrot.slane %v335_v52, 1  ;;  %v446_v58 = vsel %vm420_vm0, %v436_v49, 0.0  ;;  %v405_v59 = vadd.f32 %v389_v51, %v365_v50 }
  0x39   : > { %438 = vadd.xlane.f32.xlu0 %v437_v48  ;;  %v434_v54 = vmul.f32 %v410_v44, %v410_v44  ;;  %v391_v60 = vrot.slane %v375_v53, 2  ;;  %v449_v62 = vmul.f32 %v409_v55, %v409_v55  ;;  %v411_v63 = vmul.f32 0.11111111, %v403_v56 }
  0x3a   : > { %v367_v0 = vadd.f32 %v351_v57, %v327_v47  ;;  %447 = vadd.xlane.f32.xlu1 %v446_v58  ;;  %v413_v1 = vmul.f32 0.11111111, %v405_v59  ;;  %v416_v11 = vmul.f32 %v409_v55, %v408_v28  ;;  %v500_v41 = vand.u32 127, %v499_v36 }
  0x3b   : > { %v440_v61 = vsel %vm420_vm0, %v434_v54, 0.0  ;;  %v450_v2 = vmul.f32 %v411_v63, %v411_v63  ;;  %v453_v4 = vsel %vm420_vm0, %v449_v62, 0.0  ;;  %v417_v9 = vmul.f32 %v411_v63, %v410_v44 }
  0x3c   : > { %v407_v3 = vadd.f32 %v391_v60, %v367_v0  ;;  %v451_v5 = vmul.f32 %v413_v1, %v413_v1  ;;  %v421_v15 = vsel %vm420_vm0, %v416_v11, 0.0  ;;  %v418_v16 = vmul.f32 %v413_v1, %v894_v23 }
  0x3d   : > { %441 = vadd.xlane.f32.xlu0 %v440_v61  ;;  %v456_v6 = vsel %vm420_vm0, %v450_v2, 0.0  ;;  %v424_v13 = vsel %vm420_vm0, %v417_v9, 0.0  ;;  %v502_v42 = vshrl.u32 %v499_v36, 7 }
  0x3e   : > { %v415_v7 = vmul.f32 0.11111111, %v407_v3  ;;  %457 = vadd.xlane.f32.xlu1 %v456_v6  ;;  %v459_v10 = vsel %vm420_vm0, %v451_v5, 0.0  ;;  %v427_v18 = vsel %vm420_vm0, %v418_v16, 0.0 }
  0x3f   : > { %v503_v53 = vsub.s32 %v500_v41, %v502_v42 }
  0x40   : > { %v452_v8 = vmul.f32 %v415_v7, %v415_v7  ;;  %v419_v14 = vmul.f32 %v415_v7, %v414_v39  ;;  %v494_v7 = vld [vmem:[%s940_s1 + $0x8] sm:$0xff] }
  0x41   : > { %454 = vadd.xlane.f32.xlu0 %v453_v4 }
  0x42   : > { %v462_v12 = vsel %vm420_vm0, %v452_v8, 0.0  ;;  %v430_v17 = vsel %vm420_vm0, %v419_v14, 0.0  ;;  %v607_v8 = vld [vmem:[%s941_s2] sm:$0xf] }
  0x43   : > { %463 = vadd.xlane.f32.xlu1 %v462_v12  ;;  %810 = vmatprep.subr.msk.mxu1 %vm420_vm0, %v607_v8  ;;  %v693_v12 = vld [vmem:[%s212_s30 + $0x8] sm:$0xff] }
  0x44   : > { %811 = vmatpush3.msk.msra.mxu1 %vm420_vm0, %v607_v8 }
  0x45   : > { %460 = vadd.xlane.f32.xlu0 %v459_v10 }
  0x47   : > { %425 = vadd.xlane.f32.xlu1 %v424_v13 }
  0x49   : > { %422 = vadd.xlane.f32.xlu0 %v421_v15  ;;  %v692_v15 = vld [vmem:[%s212_s30] sm:$0xff] }
  0x4b   : > { %431 = vadd.xlane.f32.xlu1 %v430_v17 }
  0x4d   : > { %428 = vadd.xlane.f32.xlu0 %v427_v18 }
  0xc3   : > { %v445_v20 = vpop.xlane.xlu1 %444 }
  0xc4   : > { %v467_v30 = vmax.f32 %v445_v20, 1e-16 }
  0xc6   : > { %v439_v21 = vpop.xlane.xlu0 %438 }
  0xc7   : > { %v448_v22 = vpop.xlane.xlu1 %447  ;;  %v465_v23 = vmax.f32 %v439_v21, 1e-16 }
  0xc8   : > { %v468_v27 = vmax.f32 %v448_v22, 1e-16 }
  0xca   : > { %v442_v24 = vpop.xlane.xlu0 %441 }
  0xcb   : > { %v466_v25 = vmax.f32 %v442_v24, 1e-16  ;;  %v458_v26 = vpop.xlane.xlu1 %457 }
  0xcc   : > { %v478_v29 = vmax.f32 %v458_v26, 1e-16 }
  0xcd   : > { %824 = vrsqrt.f32 %v466_v25 }
  0xce   : > { %v455_v28 = vpop.xlane.xlu0 %454  ;;  %826 = vrsqrt.f32 %v465_v23 }
  0xcf   : > { %v477_v31 = vmax.f32 %v455_v28, 1e-16  ;;  %828 = vrsqrt.f32 %v478_v29 }
  0xd0   : > { %v464_v32 = vpop.xlane.xlu1 %463 }
  0xd1   : > { %830 = vrsqrt.f32 %v477_v31  ;;  %v480_v34 = vmax.f32 %v464_v32, 1e-16 }
  0xd2   : > { %832 = vrsqrt.f32 %v468_v27  ;;  %v461_v33 = vpop.xlane.xlu0 %460 }
  0xd3   : > { %834 = vrsqrt.f32 %v467_v30  ;;  %v479_v35 = vmax.f32 %v461_v33, 1e-16 }
  0xd4   : > { %836 = vrsqrt.f32 %v480_v34  ;;  %v426_v37 = vpop.xlane.xlu1 %425 }
  0xd5   : > { %838 = vrsqrt.f32 %v479_v35 }
  0xd6   : > { %v423_v38 = vpop.xlane.xlu0 %422 }
  0xd7   : > { %v825_v39 = vpop.eup %824 }
  0xd8   : > { %v827_v40 = vpop.eup %826  ;;  %v474_v43 = vmul.f32 %v825_v39, %v426_v37  ;;  %v432_v46 = vpop.xlane.xlu1 %431 }
  0xd9   : > { %v829_v44 = vpop.eup %828  ;;  %v473_v45 = vmul.f32 %v827_v40, %v423_v38 }
  0xda   : > { %v486_v48 = vmul.f32 %v829_v44, %v474_v43  ;;  %v429_v49 = vpop.xlane.xlu0 %428 }
  0xdb   : > { %v831_v47 = vpop.eup %830 }
  0xdc   : > { %v833_v50 = vpop.eup %832  ;;  %v485_v51 = vmul.f32 %v831_v47, %v473_v45  ;;  %v490_v54 = vsub.f32 1.0, %v486_v48 }
  0xdd   : > { %v835_v52 = vpop.eup %834  ;;  %v476_v55 = vmul.f32 %v833_v50, %v432_v46 }
  0xde   : > { %v837_v56 = vpop.eup %836  ;;  %v489_v57 = vsub.f32 1.0, %v485_v51  ;;  %v475_v58 = vmul.f32 %v835_v52, %v429_v49  ;;  %v508_v63 = vrot.slane %v490_v54, %v503_v53 }
  0xdf   : > { %v839_v59 = vpop.eup %838  ;;  %v488_v60 = vmul.f32 %v837_v56, %v476_v55 }
  0xe0   : > { %v487_v61 = vmul.f32 %v839_v59, %v475_v58  ;;  %v504_v62 = vrot.slane %v489_v57, %v503_v53 }
  0xe1   : > { %v492_v0 = vsub.f32 1.0, %v488_v60 }
  0xe2   : > { %v491_v1 = vsub.f32 1.0, %v487_v61  ;;  %v518_v4 = vsel %vm517_vm2, %v508_v63, %v504_v62 }
  0xe3   : > { %v516_v2 = vrot.slane %v492_v0, %v503_v53 }
  0xe4   : > { %v512_v3 = vrot.slane %v491_v1, %v503_v53 }
  0xe6   : > { %v520_v5 = vsel %vm519_vm3, %v512_v3, %v518_v4 }
  0xe7   : > { %v522_v6 = vsel %vm521_vm4, %v516_v2, %v520_v5 }
  0xe8   : > { %805 = vmatprep.subr.msk.mxu0 %vm420_vm0, %v522_v6 }
  0xe9   : > { %806 = vmatpush3.msk.msra.mxu0 %vm420_vm0, %v522_v6 }
  0xea   : > { %808 = vmatmul.mubr.msk.f32.vlgmr.msra.gmra.mrb[0].mxu0 %vm523_vm1, %v494_v7 }
 0x1bd   : > { %v809_v9 = vpop.f32.mrb[0].mxu0 }
 0x1be   : > { %v598_v10 = vpop.f32.mrb[1].mxu0 }
 0x1bf   : > { %812 = vmatprep.mubr.msk.f32.mxu1 %vm523_vm1, %v598_v10 }
 0x1c0   : > { %813 = vmatmul.mubr.msk.f32.vlgmr.msra.gmra.mrb[0].mxu1 %vm523_vm1, %v809_v9 }
 0x293   : > { %v814_v11 = vpop.f32.mrb[0].mxu1 }
 0x294   : > { %v695_v13 = vmul.f32 0.5, %v814_v11  ;;  %v683_v14 = vpop.f32.mrb[1].mxu1 }
 0x295   : > { %v694_v16 = vmul.f32 0.5, %v683_v14 }
 0x296   : > { %v697_v17 = vadd.f32 %v695_v13, %v693_v12 }
 0x297   : > { %v696_v18 = vadd.f32 %v694_v16, %v692_v15 }
 0x298   : > { %700 = vst.msk [vmem:[%s217_s7 + $0x8] sm:$0xff] %vm698_vm5, %v697_v17 }
 0x299   : > { %699 = vst.msk [vmem:[%s217_s7] sm:$0xff] %vm698_vm5, %v696_v18 }
 0x29a PF: > { %s14_s15 = sadd.s32 1, %s846_s15  }
 0x29b   : > { %p11_p4 = scmp.ge.s32.totalorder %s14_s15, 4  }
 0x29d   :  { %13 = sbr.rel (!%p11_p4) target bundleno = 1 (0x1), region = 71 }

</bundles_post_ra>
